<compile_context>
chip_gen: v6e
topology: v6e:2x2x1
jax: 0.10.0
libtpu: 0.0.40
codegen_flags: <defaults>
</compile_context>

<pallas_src>
import jax
import jax.numpy as jnp
from jax import lax
from jax.experimental import pallas as pl
from jax.experimental.pallas import tpu as pltpu

# ---------------- model dims (small, consistent with the module) -------------
LAYER_DIM = 2        # number of stacked LSTM layers
HIDDEN_DIM = 32      # hidden state size H
VOCAB_SIZE = 50
EMBED_DIM = 32       # == HIDDEN_DIM so stacked per-layer W_ih share one shape
OUTPUT_DIM = 4
FC1_DIM = 32
BATCH = 8
SEQ_LEN = 8

assert EMBED_DIM == HIDDEN_DIM, "stacked W_ih layout requires EMBED_DIM == HIDDEN_DIM"


def lstm_kernel(tok_ref,     # (BB, T)    int32 token ids (batch-major)
                emb_ref,     # (Vp, E)    embedding table, rows padded to /8
                wih_ref,     # (L, E, 4H) input->gate weights (g-cols pre-scaled x2)
                whh_ref,     # (L, H, 4H) hidden->gate weights (g-cols pre-scaled x2)
                b_ref,       # (L, 1, 4H) combined bias b_ih+b_hh (g-cols pre-scaled x2)
                fc1w_ref,    # (H, F1)
                fc1b_ref,    # (1, F1)
                fc2w_ref,    # (F1, O)
                fc2b_ref,    # (1, O)
                out_ref):    # (BB, O)
    f32 = jnp.float32
    B, T = tok_ref.shape
    Vp = emb_ref.shape[0]
    H = whh_ref.shape[1]
    G = whh_ref.shape[2]          # 4*H

    # ---- hoisted constant vregs (built once per kernel invocation) ----------
    lane = lax.broadcasted_iota(jnp.int32, (B, G), 1)
    is_g = (lane >= 2 * H) & (lane < 3 * H)
    gate_mul = jnp.where(is_g, 2.0, 1.0).astype(f32)    # 2 on g lanes, else 1
    gate_off = jnp.where(is_g, 1.0, 0.0).astype(f32)    # 1 on g lanes, else 0
    vocab_iota = lax.broadcasted_iota(jnp.int32, (B, Vp), 1)

    # Embedding folded into layer-0 input weights (off the recurrence path):
    #   x_t @ W_ih0 == onehot(tok_t) @ (E @ W_ih0)
    w0 = jnp.dot(emb_ref[...], wih_ref[0], preferred_element_type=f32)   # (Vp, 4H)
    wih1 = wih_ref[1]                                                    # (H, 4H)
    whh0, whh1 = whh_ref[0], whh_ref[1]                                  # (H, 4H)
    b0, b1 = b_ref[0], b_ref[1]                                          # (1, 4H)
    tok = tok_ref[...]                                                   # (B, T)

    def cell(gates, c, first):
        # One EUP pass: g-lane pre-activations were pre-scaled by 2, so
        #   2*sigmoid(2x) - 1 == tanh(x)  on g lanes, sigmoid(x) elsewhere.
        act = jax.nn.sigmoid(gates) * gate_mul - gate_off
        i_g = act[:, 0 * H:1 * H]
        f_g = act[:, 1 * H:2 * H]
        g_g = act[:, 2 * H:3 * H]
        o_g = act[:, 3 * H:4 * H]
        c_new = i_g * g_g if first else f_g * c + i_g * g_g
        h_new = o_g * jnp.tanh(c_new)
        return h_new, c_new

    # Wavefront over the two stacked layers inside one unrolled time loop:
    # layer-1 step t depends only on layer-0 step t and layer-1 step t-1, so
    # the two recurrences overlap.  (At H=32/T=8 everything fits in vregs; if
    # H or T grows, spill `w0`/states to VMEM scratch and switch to
    # lax.fori_loop(..., unroll=True) segments to bound live ranges.)
    h0 = c0 = h1 = c1 = None
    for t in range(T):                                   # static unroll, T = 8
        onehot_t = (tok[:, t:t + 1] == vocab_iota).astype(f32)          # (B, Vp)
        g0 = jnp.dot(onehot_t, w0, preferred_element_type=f32) + b0
        if t > 0:                                        # h0 == 0 at t == 0
            g0 = g0 + jnp.dot(h0, whh0, preferred_element_type=f32)
        h0, c0 = cell(g0, c0, t == 0)

        g1 = jnp.dot(h0, wih1, preferred_element_type=f32) + b1
        if t > 0:                                        # h1 == 0 at t == 0
            g1 = g1 + jnp.dot(h1, whh1, preferred_element_type=f32)
        h1, c1 = cell(g1, c1, t == 0)
        # inter-layer nn.LSTM dropout: identity in eval mode

    # Head: fc1 -> dropout(identity in eval) -> fc2 -> sigmoid on h1[T-1].
    y = jnp.dot(h1, fc1w_ref[...], preferred_element_type=f32) + fc1b_ref[...]
    y = jnp.dot(y, fc2w_ref[...], preferred_element_type=f32) + fc2b_ref[...]
    out_ref[...] = jax.nn.sigmoid(y)


def init_params(key):
    """Canonical (PyTorch-layout-equivalent) parameters."""
    ks = jax.random.split(key, 12)
    bound = 1.0 / jnp.sqrt(HIDDEN_DIM)
    u = lambda k, shape, b: jax.random.uniform(k, shape, jnp.float32, -b, b)

    embedding = jax.random.normal(ks[0], (VOCAB_SIZE, EMBED_DIM), jnp.float32)

    # stacked per-layer LSTM weights; layer 0 input width == EMBED_DIM == H
    wih = u(ks[1], (LAYER_DIM, EMBED_DIM, 4 * HIDDEN_DIM), bound)
    whh = u(ks[2], (LAYER_DIM, HIDDEN_DIM, 4 * HIDDEN_DIM), bound)
    b_ih = u(ks[3], (LAYER_DIM, 1, 4 * HIDDEN_DIM), bound)
    b_hh = u(ks[4], (LAYER_DIM, 1, 4 * HIDDEN_DIM), bound)
    b = b_ih + b_hh

    fc1_bound = 1.0 / jnp.sqrt(HIDDEN_DIM)
    fc1w = u(ks[5], (HIDDEN_DIM, FC1_DIM), fc1_bound)
    fc1b = u(ks[6], (1, FC1_DIM), fc1_bound)
    fc2_bound = 1.0 / jnp.sqrt(FC1_DIM)
    fc2w = u(ks[7], (FC1_DIM, OUTPUT_DIM), fc2_bound)
    fc2b = u(ks[8], (1, OUTPUT_DIM), fc2_bound)

    return dict(embedding=embedding, wih=wih, whh=whh, b=b,
                fc1w=fc1w, fc1b=fc1b, fc2w=fc2w, fc2b=fc2b)


def prepare_kernel_params(params):
    """ONE-TIME transform of canonical params into kernel layout (not per call).

    * pads the embedding table rows to a multiple of 8 (sublane alignment),
    * scales the g-gate columns [2H,3H) of W_ih / W_hh / bias by 2 so the
      kernel can evaluate tanh(x) = 2*sigmoid(2x) - 1 with one EUP pass/step.
    """
    H = HIDDEN_DIM
    col = jnp.arange(4 * H)
    scale = jnp.where((col >= 2 * H) & (col < 3 * H), 2.0, 1.0).astype(jnp.float32)
    vp = ((VOCAB_SIZE + 7) // 8) * 8
    emb = jnp.zeros((vp, EMBED_DIM), jnp.float32).at[:VOCAB_SIZE].set(
        params["embedding"])
    return dict(
        embedding=emb,
        wih=params["wih"] * scale,
        whh=params["whh"] * scale,
        b=params["b"] * scale,
        fc1w=params["fc1w"], fc1b=params["fc1b"],
        fc2w=params["fc2w"], fc2b=params["fc2b"],
    )


def _num_tensorcores() -> int:
    """Best-effort TensorCore-per-chip count (v5e/v6e = 1, v7x/v4/v5p = 2)."""
    try:
        kind = jax.devices()[0].device_kind.lower()
    except Exception:
        return 1
    single_tc = ("v5e", "v5 lite", "v5litepod", "v6e", "v6 lite")
    return 1 if any(s in kind for s in single_tc) else 2


def _pick_batch_block(batch: int) -> int:
    # Give the "parallel" grid >= 2 steps once B >= 16 on 2-TC chips (v7x) so
    # both TensorCores get work; keep grid=(1,) on single-TC v5e/v6e (and at
    # the tiny test batch) to avoid ~0.35us per extra sequential grid step.
    if batch < 16 or batch % 8 != 0 or _num_tensorcores() < 2:
        return batch
    bb = ((batch // 2) + 7) // 8 * 8
    while batch % bb:
        bb -= 8
    return max(bb, 8)


@jax.jit
def lstm_forward(tokens, kparams):
    """Whole forward pass as a single fused pallas_call (no surrounding ops)."""
    if tokens.dtype != jnp.int32:
        tokens = tokens.astype(jnp.int32)
    B, T = tokens.shape
    BB = _pick_batch_block(B)
    grid = (B // BB,)

    emb, wih, whh, b = (kparams["embedding"], kparams["wih"],
                        kparams["whh"], kparams["b"])
    fc1w, fc1b = kparams["fc1w"], kparams["fc1b"]
    fc2w, fc2b = kparams["fc2w"], kparams["fc2b"]

    rep2 = lambda i: (0, 0)        # replicated (weight) blocks
    rep3 = lambda i: (0, 0, 0)

    return pl.pallas_call(
        lstm_kernel,
        out_shape=jax.ShapeDtypeStruct((B, OUTPUT_DIM), jnp.float32),
        grid=grid,
        in_specs=[
            pl.BlockSpec((BB, T), lambda i: (i, 0)),     # tokens: batch block
            pl.BlockSpec(emb.shape, rep2),
            pl.BlockSpec(wih.shape, rep3),
            pl.BlockSpec(whh.shape, rep3),
            pl.BlockSpec(b.shape, rep3),
            pl.BlockSpec(fc1w.shape, rep2),
            pl.BlockSpec(fc1b.shape, rep2),
            pl.BlockSpec(fc2w.shape, rep2),
            pl.BlockSpec(fc2b.shape, rep2),
        ],
        out_specs=pl.BlockSpec((BB, OUTPUT_DIM), lambda i: (i, 0)),
        compiler_params=pltpu.CompilerParams(
            dimension_semantics=("parallel",)),
    )(tokens, emb, wih, whh, b, fc1w, fc1b, fc2w, fc2b)


def lstm_reference(tokens, params):
    """Pure-JAX reference on the canonical params (PyTorch eval semantics)."""
    emb = jnp.take(params["embedding"], tokens, axis=0)       # (B, T, E)
    B = emb.shape[0]
    H = HIDDEN_DIM
    seq = jnp.transpose(emb, (1, 0, 2)).astype(jnp.float32)   # (T, B, E)
    h = None
    for layer in range(LAYER_DIM):
        wih, whh, b = params["wih"][layer], params["whh"][layer], params["b"][layer]
        h = jnp.zeros((B, H), jnp.float32)
        c = jnp.zeros((B, H), jnp.float32)
        outs = []
        for t in range(seq.shape[0]):
            g = seq[t] @ wih + h @ whh + b
            i = jax.nn.sigmoid(g[:, :H])
            f = jax.nn.sigmoid(g[:, H:2 * H])
            gg = jnp.tanh(g[:, 2 * H:3 * H])
            o = jax.nn.sigmoid(g[:, 3 * H:])
            c = f * c + i * gg
            h = o * jnp.tanh(c)
            outs.append(h)
        seq = jnp.stack(outs, axis=0)
    y = h @ params["fc1w"] + params["fc1b"]
    y = y @ params["fc2w"] + params["fc2b"]
    return jax.nn.sigmoid(y)


if __name__ == "__main__":
    key = jax.random.PRNGKey(0)
    pkey, xkey = jax.random.split(key)
    params = init_params(pkey)
    kparams = prepare_kernel_params(params)   # one-time, outside the fwd path
    tokens = jax.random.randint(xkey, (BATCH, SEQ_LEN), 0, VOCAB_SIZE,
                                dtype=jnp.int32)

    out = lstm_forward(tokens, kparams)
    jax.block_until_ready(out)

    ref = lstm_reference(tokens, params)
    assert out.shape == (BATCH, OUTPUT_DIM)
    assert bool(jnp.all((out >= 0.0) & (out <= 1.0)))
    err = float(jnp.max(jnp.abs(out - ref)))
    assert bool(jnp.allclose(out, ref, atol=2e-4, rtol=2e-4)), f"max abs err {err}"
    print("KERNEL_OK")
</pallas_src>

<mosaic_0001>
module attributes {stable_mosaic.version = 11 : i64} {
  func.func @lstm_kernel(%arg0: i32, %arg1: memref<8x8xi32, #tpu.memory_space<vmem>>, %arg2: memref<56x32xf32, #tpu.memory_space<vmem>>, %arg3: memref<2x32x128xf32, #tpu.memory_space<vmem>>, %arg4: memref<2x32x128xf32, #tpu.memory_space<vmem>>, %arg5: memref<2x1x128xf32, #tpu.memory_space<vmem>>, %arg6: memref<32x32xf32, #tpu.memory_space<vmem>>, %arg7: memref<1x32xf32, #tpu.memory_space<vmem>>, %arg8: memref<32x4xf32, #tpu.memory_space<vmem>>, %arg9: memref<1x4xf32, #tpu.memory_space<vmem>>, %arg10: memref<8x4xf32, #tpu.memory_space<vmem>>) attributes {dimension_semantics = [#tpu.dimension_semantics<parallel>], iteration_bounds = array<i64: 1>, scalar_prefetch = 0 : i64, scratch_operands = 0 : i64, tpu.core_type = #tpu.core_type<tc>, window_params = [{transform_indices = @transform_0, window_bounds = array<i64: 8, 8>}, {pipeline_mode = #tpu.pipeline_mode<synchronous>, transform_indices = @transform_1, window_bounds = array<i64: 56, 32>}, {pipeline_mode = #tpu.pipeline_mode<synchronous>, transform_indices = @transform_2, window_bounds = array<i64: 2, 32, 128>}, {pipeline_mode = #tpu.pipeline_mode<synchronous>, transform_indices = @transform_3, window_bounds = array<i64: 2, 32, 128>}, {pipeline_mode = #tpu.pipeline_mode<synchronous>, transform_indices = @transform_4, window_bounds = array<i64: 2, 1, 128>}, {pipeline_mode = #tpu.pipeline_mode<synchronous>, transform_indices = @transform_5, window_bounds = array<i64: 32, 32>}, {pipeline_mode = #tpu.pipeline_mode<synchronous>, transform_indices = @transform_6, window_bounds = array<i64: 1, 32>}, {pipeline_mode = #tpu.pipeline_mode<synchronous>, transform_indices = @transform_7, window_bounds = array<i64: 32, 4>}, {pipeline_mode = #tpu.pipeline_mode<synchronous>, transform_indices = @transform_8, window_bounds = array<i64: 1, 4>}, {transform_indices = @transform_9, window_bounds = array<i64: 8, 4>}]} {
    %0 = tpu.iota {dimensions = array<i32: 1>} : vector<8x128xi32>
    %c64_i32 = arith.constant 64 : i32
    %1 = vector.broadcast %c64_i32 : i32 to vector<8x128xi32>
    %2 = arith.cmpi sge, %0, %1 : vector<8x128xi32>
    %c96_i32 = arith.constant 96 : i32
    %3 = vector.broadcast %c96_i32 : i32 to vector<8x128xi32>
    %4 = arith.cmpi slt, %0, %3 : vector<8x128xi32>
    %5 = arith.andi %2, %4 : vector<8x128xi1>
    %cst = arith.constant 2.000000e+00 : f32
    %cst_0 = arith.constant 1.000000e+00 : f32
    %6 = vector.broadcast %cst : f32 to vector<8x128xf32>
    %7 = vector.broadcast %cst_0 : f32 to vector<8x128xf32>
    %8 = arith.select %5, %6, %7 : vector<8x128xi1>, vector<8x128xf32>
    %cst_1 = arith.constant 1.000000e+00 : f32
    %cst_2 = arith.constant 0.000000e+00 : f32
    %9 = vector.broadcast %cst_1 : f32 to vector<8x128xf32>
    %10 = vector.broadcast %cst_2 : f32 to vector<8x128xf32>
    %11 = arith.select %5, %9, %10 : vector<8x128xi1>, vector<8x128xf32>
    %12 = tpu.iota {dimensions = array<i32: 1>} : vector<8x56xi32>
    %c0 = arith.constant 0 : index
    %c0_3 = arith.constant 0 : index
    %13 = vector.load %arg2[%c0, %c0_3] : memref<56x32xf32, #tpu.memory_space<vmem>>, vector<56x32xf32>
    %c0_4 = arith.constant 0 : index
    %c0_5 = arith.constant 0 : index
    %c0_6 = arith.constant 0 : index
    %14 = vector.load %arg3[%c0_4, %c0_5, %c0_6] : memref<2x32x128xf32, #tpu.memory_space<vmem>>, vector<1x32x128xf32>
    %15 = vector.shape_cast %14 : vector<1x32x128xf32> to vector<32x128xf32>
    %cst_7 = arith.constant dense<0.000000e+00> : vector<56x128xf32>
    %16 = tpu.matmul %13, %15, %cst_7 {dimension_numbers = #tpu.dot_dimension_numbers<[1], [0], [0], [1], [0, 0, 1, 1], [], []>} : vector<56x32xf32>, vector<32x128xf32>, vector<56x128xf32> -> vector<56x128xf32>
    %c1 = arith.constant 1 : index
    %c0_8 = arith.constant 0 : index
    %c0_9 = arith.constant 0 : index
    %17 = vector.load %arg3[%c1, %c0_8, %c0_9] : memref<2x32x128xf32, #tpu.memory_space<vmem>>, vector<1x32x128xf32>
    %18 = vector.shape_cast %17 : vector<1x32x128xf32> to vector<32x128xf32>
    %c0_10 = arith.constant 0 : index
    %c0_11 = arith.constant 0 : index
    %c0_12 = arith.constant 0 : index
    %19 = vector.load %arg4[%c0_10, %c0_11, %c0_12] : memref<2x32x128xf32, #tpu.memory_space<vmem>>, vector<1x32x128xf32>
    %20 = vector.shape_cast %19 : vector<1x32x128xf32> to vector<32x128xf32>
    %c1_13 = arith.constant 1 : index
    %c0_14 = arith.constant 0 : index
    %c0_15 = arith.constant 0 : index
    %21 = vector.load %arg4[%c1_13, %c0_14, %c0_15] : memref<2x32x128xf32, #tpu.memory_space<vmem>>, vector<1x32x128xf32>
    %22 = vector.shape_cast %21 : vector<1x32x128xf32> to vector<32x128xf32>
    %c0_16 = arith.constant 0 : index
    %c0_17 = arith.constant 0 : index
    %c0_18 = arith.constant 0 : index
    %23 = vector.load %arg5[%c0_16, %c0_17, %c0_18] : memref<2x1x128xf32, #tpu.memory_space<vmem>>, vector<1x1x128xf32>
    %24 = vector.shape_cast %23 : vector<1x1x128xf32> to vector<1x128xf32>
    %c1_19 = arith.constant 1 : index
    %c0_20 = arith.constant 0 : index
    %c0_21 = arith.constant 0 : index
    %25 = vector.load %arg5[%c1_19, %c0_20, %c0_21] : memref<2x1x128xf32, #tpu.memory_space<vmem>>, vector<1x1x128xf32>
    %26 = vector.shape_cast %25 : vector<1x1x128xf32> to vector<1x128xf32>
    %c0_22 = arith.constant 0 : index
    %c0_23 = arith.constant 0 : index
    %27 = vector.load %arg1[%c0_22, %c0_23] : memref<8x8xi32, #tpu.memory_space<vmem>>, vector<8x8xi32>
    %28 = vector.extract_strided_slice %27 {offsets = [0, 0], sizes = [8, 1], strides = [1, 1]} : vector<8x8xi32> to vector<8x1xi32>
    %29 = vector.broadcast %28 : vector<8x1xi32> to vector<8x56xi32>
    %30 = arith.cmpi eq, %29, %12 : vector<8x56xi32>
    %31 = arith.extui %30 : vector<8x56xi1> to vector<8x56xi32>
    %32 = arith.sitofp %31 : vector<8x56xi32> to vector<8x56xf32>
    %cst_24 = arith.constant dense<0.000000e+00> : vector<8x128xf32>
    %33 = tpu.matmul %32, %16, %cst_24 {dimension_numbers = #tpu.dot_dimension_numbers<[1], [0], [0], [1], [0, 0, 1, 1], [], []>} : vector<8x56xf32>, vector<56x128xf32>, vector<8x128xf32> -> vector<8x128xf32>
    %34 = vector.broadcast %24 : vector<1x128xf32> to vector<8x128xf32>
    %35 = arith.addf %33, %34 : vector<8x128xf32>
    %36 = arith.negf %35 : vector<8x128xf32>
    %37 = math.exp %36 : vector<8x128xf32>
    %cst_25 = arith.constant 1.000000e+00 : f32
    %38 = vector.broadcast %cst_25 : f32 to vector<8x128xf32>
    %39 = arith.addf %38, %37 : vector<8x128xf32>
    %40 = arith.divf %38, %39 : vector<8x128xf32>
    %41 = arith.mulf %40, %8 : vector<8x128xf32>
    %42 = arith.subf %41, %11 : vector<8x128xf32>
    %43 = vector.extract_strided_slice %42 {offsets = [0, 0], sizes = [8, 32], strides = [1, 1]} : vector<8x128xf32> to vector<8x32xf32>
    %44 = vector.extract_strided_slice %42 {offsets = [0, 64], sizes = [8, 32], strides = [1, 1]} : vector<8x128xf32> to vector<8x32xf32>
    %45 = vector.extract_strided_slice %42 {offsets = [0, 96], sizes = [8, 32], strides = [1, 1]} : vector<8x128xf32> to vector<8x32xf32>
    %46 = arith.mulf %43, %44 : vector<8x32xf32>
    %47 = math.tanh %46 : vector<8x32xf32>
    %48 = arith.mulf %45, %47 : vector<8x32xf32>
    %cst_26 = arith.constant dense<0.000000e+00> : vector<8x128xf32>
    %49 = tpu.matmul %48, %18, %cst_26 {dimension_numbers = #tpu.dot_dimension_numbers<[1], [0], [0], [1], [0, 0, 1, 1], [], []>} : vector<8x32xf32>, vector<32x128xf32>, vector<8x128xf32> -> vector<8x128xf32>
    %50 = vector.broadcast %26 : vector<1x128xf32> to vector<8x128xf32>
    %51 = arith.addf %49, %50 : vector<8x128xf32>
    %52 = arith.negf %51 : vector<8x128xf32>
    %53 = math.exp %52 : vector<8x128xf32>
    %cst_27 = arith.constant 1.000000e+00 : f32
    %54 = vector.broadcast %cst_27 : f32 to vector<8x128xf32>
    %55 = arith.addf %54, %53 : vector<8x128xf32>
    %56 = arith.divf %54, %55 : vector<8x128xf32>
    %57 = arith.mulf %56, %8 : vector<8x128xf32>
    %58 = arith.subf %57, %11 : vector<8x128xf32>
    %59 = vector.extract_strided_slice %58 {offsets = [0, 0], sizes = [8, 32], strides = [1, 1]} : vector<8x128xf32> to vector<8x32xf32>
    %60 = vector.extract_strided_slice %58 {offsets = [0, 64], sizes = [8, 32], strides = [1, 1]} : vector<8x128xf32> to vector<8x32xf32>
    %61 = vector.extract_strided_slice %58 {offsets = [0, 96], sizes = [8, 32], strides = [1, 1]} : vector<8x128xf32> to vector<8x32xf32>
    %62 = arith.mulf %59, %60 : vector<8x32xf32>
    %63 = math.tanh %62 : vector<8x32xf32>
    %64 = arith.mulf %61, %63 : vector<8x32xf32>
    %65 = vector.extract_strided_slice %27 {offsets = [0, 1], sizes = [8, 1], strides = [1, 1]} : vector<8x8xi32> to vector<8x1xi32>
    %66 = vector.broadcast %65 : vector<8x1xi32> to vector<8x56xi32>
    %67 = arith.cmpi eq, %66, %12 : vector<8x56xi32>
    %68 = arith.extui %67 : vector<8x56xi1> to vector<8x56xi32>
    %69 = arith.sitofp %68 : vector<8x56xi32> to vector<8x56xf32>
    %cst_28 = arith.constant dense<0.000000e+00> : vector<8x128xf32>
    %70 = tpu.matmul %69, %16, %cst_28 {dimension_numbers = #tpu.dot_dimension_numbers<[1], [0], [0], [1], [0, 0, 1, 1], [], []>} : vector<8x56xf32>, vector<56x128xf32>, vector<8x128xf32> -> vector<8x128xf32>
    %71 = vector.broadcast %24 : vector<1x128xf32> to vector<8x128xf32>
    %72 = arith.addf %70, %71 : vector<8x128xf32>
    %cst_29 = arith.constant dense<0.000000e+00> : vector<8x128xf32>
    %73 = tpu.matmul %48, %20, %cst_29 {dimension_numbers = #tpu.dot_dimension_numbers<[1], [0], [0], [1], [0, 0, 1, 1], [], []>} : vector<8x32xf32>, vector<32x128xf32>, vector<8x128xf32> -> vector<8x128xf32>
    %74 = arith.addf %72, %73 : vector<8x128xf32>
    %75 = arith.negf %74 : vector<8x128xf32>
    %76 = math.exp %75 : vector<8x128xf32>
    %cst_30 = arith.constant 1.000000e+00 : f32
    %77 = vector.broadcast %cst_30 : f32 to vector<8x128xf32>
    %78 = arith.addf %77, %76 : vector<8x128xf32>
    %79 = arith.divf %77, %78 : vector<8x128xf32>
    %80 = arith.mulf %79, %8 : vector<8x128xf32>
    %81 = arith.subf %80, %11 : vector<8x128xf32>
    %82 = vector.extract_strided_slice %81 {offsets = [0, 0], sizes = [8, 32], strides = [1, 1]} : vector<8x128xf32> to vector<8x32xf32>
    %83 = vector.extract_strided_slice %81 {offsets = [0, 32], sizes = [8, 32], strides = [1, 1]} : vector<8x128xf32> to vector<8x32xf32>
    %84 = vector.extract_strided_slice %81 {offsets = [0, 64], sizes = [8, 32], strides = [1, 1]} : vector<8x128xf32> to vector<8x32xf32>
    %85 = vector.extract_strided_slice %81 {offsets = [0, 96], sizes = [8, 32], strides = [1, 1]} : vector<8x128xf32> to vector<8x32xf32>
    %86 = arith.mulf %83, %46 : vector<8x32xf32>
    %87 = arith.mulf %82, %84 : vector<8x32xf32>
    %88 = arith.addf %86, %87 : vector<8x32xf32>
    %89 = math.tanh %88 : vector<8x32xf32>
    %90 = arith.mulf %85, %89 : vector<8x32xf32>
    %cst_31 = arith.constant dense<0.000000e+00> : vector<8x128xf32>
    %91 = tpu.matmul %90, %18, %cst_31 {dimension_numbers = #tpu.dot_dimension_numbers<[1], [0], [0], [1], [0, 0, 1, 1], [], []>} : vector<8x32xf32>, vector<32x128xf32>, vector<8x128xf32> -> vector<8x128xf32>
    %92 = vector.broadcast %26 : vector<1x128xf32> to vector<8x128xf32>
    %93 = arith.addf %91, %92 : vector<8x128xf32>
    %cst_32 = arith.constant dense<0.000000e+00> : vector<8x128xf32>
    %94 = tpu.matmul %64, %22, %cst_32 {dimension_numbers = #tpu.dot_dimension_numbers<[1], [0], [0], [1], [0, 0, 1, 1], [], []>} : vector<8x32xf32>, vector<32x128xf32>, vector<8x128xf32> -> vector<8x128xf32>
    %95 = arith.addf %93, %94 : vector<8x128xf32>
    %96 = arith.negf %95 : vector<8x128xf32>
    %97 = math.exp %96 : vector<8x128xf32>
    %cst_33 = arith.constant 1.000000e+00 : f32
    %98 = vector.broadcast %cst_33 : f32 to vector<8x128xf32>
    %99 = arith.addf %98, %97 : vector<8x128xf32>
    %100 = arith.divf %98, %99 : vector<8x128xf32>
    %101 = arith.mulf %100, %8 : vector<8x128xf32>
    %102 = arith.subf %101, %11 : vector<8x128xf32>
    %103 = vector.extract_strided_slice %102 {offsets = [0, 0], sizes = [8, 32], strides = [1, 1]} : vector<8x128xf32> to vector<8x32xf32>
    %104 = vector.extract_strided_slice %102 {offsets = [0, 32], sizes = [8, 32], strides = [1, 1]} : vector<8x128xf32> to vector<8x32xf32>
    %105 = vector.extract_strided_slice %102 {offsets = [0, 64], sizes = [8, 32], strides = [1, 1]} : vector<8x128xf32> to vector<8x32xf32>
    %106 = vector.extract_strided_slice %102 {offsets = [0, 96], sizes = [8, 32], strides = [1, 1]} : vector<8x128xf32> to vector<8x32xf32>
    %107 = arith.mulf %104, %62 : vector<8x32xf32>
    %108 = arith.mulf %103, %105 : vector<8x32xf32>
    %109 = arith.addf %107, %108 : vector<8x32xf32>
    %110 = math.tanh %109 : vector<8x32xf32>
    %111 = arith.mulf %106, %110 : vector<8x32xf32>
    %112 = vector.extract_strided_slice %27 {offsets = [0, 2], sizes = [8, 1], strides = [1, 1]} : vector<8x8xi32> to vector<8x1xi32>
    %113 = vector.broadcast %112 : vector<8x1xi32> to vector<8x56xi32>
    %114 = arith.cmpi eq, %113, %12 : vector<8x56xi32>
    %115 = arith.extui %114 : vector<8x56xi1> to vector<8x56xi32>
    %116 = arith.sitofp %115 : vector<8x56xi32> to vector<8x56xf32>
    %cst_34 = arith.constant dense<0.000000e+00> : vector<8x128xf32>
    %117 = tpu.matmul %116, %16, %cst_34 {dimension_numbers = #tpu.dot_dimension_numbers<[1], [0], [0], [1], [0, 0, 1, 1], [], []>} : vector<8x56xf32>, vector<56x128xf32>, vector<8x128xf32> -> vector<8x128xf32>
    %118 = vector.broadcast %24 : vector<1x128xf32> to vector<8x128xf32>
    %119 = arith.addf %117, %118 : vector<8x128xf32>
    %cst_35 = arith.constant dense<0.000000e+00> : vector<8x128xf32>
    %120 = tpu.matmul %90, %20, %cst_35 {dimension_numbers = #tpu.dot_dimension_numbers<[1], [0], [0], [1], [0, 0, 1, 1], [], []>} : vector<8x32xf32>, vector<32x128xf32>, vector<8x128xf32> -> vector<8x128xf32>
    %121 = arith.addf %119, %120 : vector<8x128xf32>
    %122 = arith.negf %121 : vector<8x128xf32>
    %123 = math.exp %122 : vector<8x128xf32>
    %cst_36 = arith.constant 1.000000e+00 : f32
    %124 = vector.broadcast %cst_36 : f32 to vector<8x128xf32>
    %125 = arith.addf %124, %123 : vector<8x128xf32>
    %126 = arith.divf %124, %125 : vector<8x128xf32>
    %127 = arith.mulf %126, %8 : vector<8x128xf32>
    %128 = arith.subf %127, %11 : vector<8x128xf32>
    %129 = vector.extract_strided_slice %128 {offsets = [0, 0], sizes = [8, 32], strides = [1, 1]} : vector<8x128xf32> to vector<8x32xf32>
    %130 = vector.extract_strided_slice %128 {offsets = [0, 32], sizes = [8, 32], strides = [1, 1]} : vector<8x128xf32> to vector<8x32xf32>
    %131 = vector.extract_strided_slice %128 {offsets = [0, 64], sizes = [8, 32], strides = [1, 1]} : vector<8x128xf32> to vector<8x32xf32>
    %132 = vector.extract_strided_slice %128 {offsets = [0, 96], sizes = [8, 32], strides = [1, 1]} : vector<8x128xf32> to vector<8x32xf32>
    %133 = arith.mulf %130, %88 : vector<8x32xf32>
    %134 = arith.mulf %129, %131 : vector<8x32xf32>
    %135 = arith.addf %133, %134 : vector<8x32xf32>
    %136 = math.tanh %135 : vector<8x32xf32>
    %137 = arith.mulf %132, %136 : vector<8x32xf32>
    %cst_37 = arith.constant dense<0.000000e+00> : vector<8x128xf32>
    %138 = tpu.matmul %137, %18, %cst_37 {dimension_numbers = #tpu.dot_dimension_numbers<[1], [0], [0], [1], [0, 0, 1, 1], [], []>} : vector<8x32xf32>, vector<32x128xf32>, vector<8x128xf32> -> vector<8x128xf32>
    %139 = vector.broadcast %26 : vector<1x128xf32> to vector<8x128xf32>
    %140 = arith.addf %138, %139 : vector<8x128xf32>
    %cst_38 = arith.constant dense<0.000000e+00> : vector<8x128xf32>
    %141 = tpu.matmul %111, %22, %cst_38 {dimension_numbers = #tpu.dot_dimension_numbers<[1], [0], [0], [1], [0, 0, 1, 1], [], []>} : vector<8x32xf32>, vector<32x128xf32>, vector<8x128xf32> -> vector<8x128xf32>
    %142 = arith.addf %140, %141 : vector<8x128xf32>
    %143 = arith.negf %142 : vector<8x128xf32>
    %144 = math.exp %143 : vector<8x128xf32>
    %cst_39 = arith.constant 1.000000e+00 : f32
    %145 = vector.broadcast %cst_39 : f32 to vector<8x128xf32>
    %146 = arith.addf %145, %144 : vector<8x128xf32>
    %147 = arith.divf %145, %146 : vector<8x128xf32>
    %148 = arith.mulf %147, %8 : vector<8x128xf32>
    %149 = arith.subf %148, %11 : vector<8x128xf32>
    %150 = vector.extract_strided_slice %149 {offsets = [0, 0], sizes = [8, 32], strides = [1, 1]} : vector<8x128xf32> to vector<8x32xf32>
    %151 = vector.extract_strided_slice %149 {offsets = [0, 32], sizes = [8, 32], strides = [1, 1]} : vector<8x128xf32> to vector<8x32xf32>
    %152 = vector.extract_strided_slice %149 {offsets = [0, 64], sizes = [8, 32], strides = [1, 1]} : vector<8x128xf32> to vector<8x32xf32>
    %153 = vector.extract_strided_slice %149 {offsets = [0, 96], sizes = [8, 32], strides = [1, 1]} : vector<8x128xf32> to vector<8x32xf32>
    %154 = arith.mulf %151, %109 : vector<8x32xf32>
    %155 = arith.mulf %150, %152 : vector<8x32xf32>
    %156 = arith.addf %154, %155 : vector<8x32xf32>
    %157 = math.tanh %156 : vector<8x32xf32>
    %158 = arith.mulf %153, %157 : vector<8x32xf32>
    %159 = vector.extract_strided_slice %27 {offsets = [0, 3], sizes = [8, 1], strides = [1, 1]} : vector<8x8xi32> to vector<8x1xi32>
    %160 = vector.broadcast %159 : vector<8x1xi32> to vector<8x56xi32>
    %161 = arith.cmpi eq, %160, %12 : vector<8x56xi32>
    %162 = arith.extui %161 : vector<8x56xi1> to vector<8x56xi32>
    %163 = arith.sitofp %162 : vector<8x56xi32> to vector<8x56xf32>
    %cst_40 = arith.constant dense<0.000000e+00> : vector<8x128xf32>
    %164 = tpu.matmul %163, %16, %cst_40 {dimension_numbers = #tpu.dot_dimension_numbers<[1], [0], [0], [1], [0, 0, 1, 1], [], []>} : vector<8x56xf32>, vector<56x128xf32>, vector<8x128xf32> -> vector<8x128xf32>
    %165 = vector.broadcast %24 : vector<1x128xf32> to vector<8x128xf32>
    %166 = arith.addf %164, %165 : vector<8x128xf32>
    %cst_41 = arith.constant dense<0.000000e+00> : vector<8x128xf32>
    %167 = tpu.matmul %137, %20, %cst_41 {dimension_numbers = #tpu.dot_dimension_numbers<[1], [0], [0], [1], [0, 0, 1, 1], [], []>} : vector<8x32xf32>, vector<32x128xf32>, vector<8x128xf32> -> vector<8x128xf32>
    %168 = arith.addf %166, %167 : vector<8x128xf32>
    %169 = arith.negf %168 : vector<8x128xf32>
    %170 = math.exp %169 : vector<8x128xf32>
    %cst_42 = arith.constant 1.000000e+00 : f32
    %171 = vector.broadcast %cst_42 : f32 to vector<8x128xf32>
    %172 = arith.addf %171, %170 : vector<8x128xf32>
    %173 = arith.divf %171, %172 : vector<8x128xf32>
    %174 = arith.mulf %173, %8 : vector<8x128xf32>
    %175 = arith.subf %174, %11 : vector<8x128xf32>
    %176 = vector.extract_strided_slice %175 {offsets = [0, 0], sizes = [8, 32], strides = [1, 1]} : vector<8x128xf32> to vector<8x32xf32>
    %177 = vector.extract_strided_slice %175 {offsets = [0, 32], sizes = [8, 32], strides = [1, 1]} : vector<8x128xf32> to vector<8x32xf32>
    %178 = vector.extract_strided_slice %175 {offsets = [0, 64], sizes = [8, 32], strides = [1, 1]} : vector<8x128xf32> to vector<8x32xf32>
    %179 = vector.extract_strided_slice %175 {offsets = [0, 96], sizes = [8, 32], strides = [1, 1]} : vector<8x128xf32> to vector<8x32xf32>
    %180 = arith.mulf %177, %135 : vector<8x32xf32>
    %181 = arith.mulf %176, %178 : vector<8x32xf32>
    %182 = arith.addf %180, %181 : vector<8x32xf32>
    %183 = math.tanh %182 : vector<8x32xf32>
    %184 = arith.mulf %179, %183 : vector<8x32xf32>
    %cst_43 = arith.constant dense<0.000000e+00> : vector<8x128xf32>
    %185 = tpu.matmul %184, %18, %cst_43 {dimension_numbers = #tpu.dot_dimension_numbers<[1], [0], [0], [1], [0, 0, 1, 1], [], []>} : vector<8x32xf32>, vector<32x128xf32>, vector<8x128xf32> -> vector<8x128xf32>
    %186 = vector.broadcast %26 : vector<1x128xf32> to vector<8x128xf32>
    %187 = arith.addf %185, %186 : vector<8x128xf32>
    %cst_44 = arith.constant dense<0.000000e+00> : vector<8x128xf32>
    %188 = tpu.matmul %158, %22, %cst_44 {dimension_numbers = #tpu.dot_dimension_numbers<[1], [0], [0], [1], [0, 0, 1, 1], [], []>} : vector<8x32xf32>, vector<32x128xf32>, vector<8x128xf32> -> vector<8x128xf32>
    %189 = arith.addf %187, %188 : vector<8x128xf32>
    %190 = arith.negf %189 : vector<8x128xf32>
    %191 = math.exp %190 : vector<8x128xf32>
    %cst_45 = arith.constant 1.000000e+00 : f32
    %192 = vector.broadcast %cst_45 : f32 to vector<8x128xf32>
    %193 = arith.addf %192, %191 : vector<8x128xf32>
    %194 = arith.divf %192, %193 : vector<8x128xf32>
    %195 = arith.mulf %194, %8 : vector<8x128xf32>
    %196 = arith.subf %195, %11 : vector<8x128xf32>
    %197 = vector.extract_strided_slice %196 {offsets = [0, 0], sizes = [8, 32], strides = [1, 1]} : vector<8x128xf32> to vector<8x32xf32>
    %198 = vector.extract_strided_slice %196 {offsets = [0, 32], sizes = [8, 32], strides = [1, 1]} : vector<8x128xf32> to vector<8x32xf32>
    %199 = vector.extract_strided_slice %196 {offsets = [0, 64], sizes = [8, 32], strides = [1, 1]} : vector<8x128xf32> to vector<8x32xf32>
    %200 = vector.extract_strided_slice %196 {offsets = [0, 96], sizes = [8, 32], strides = [1, 1]} : vector<8x128xf32> to vector<8x32xf32>
    %201 = arith.mulf %198, %156 : vector<8x32xf32>
    %202 = arith.mulf %197, %199 : vector<8x32xf32>
    %203 = arith.addf %201, %202 : vector<8x32xf32>
    %204 = math.tanh %203 : vector<8x32xf32>
    %205 = arith.mulf %200, %204 : vector<8x32xf32>
    %206 = vector.extract_strided_slice %27 {offsets = [0, 4], sizes = [8, 1], strides = [1, 1]} : vector<8x8xi32> to vector<8x1xi32>
    %207 = vector.broadcast %206 : vector<8x1xi32> to vector<8x56xi32>
    %208 = arith.cmpi eq, %207, %12 : vector<8x56xi32>
    %209 = arith.extui %208 : vector<8x56xi1> to vector<8x56xi32>
    %210 = arith.sitofp %209 : vector<8x56xi32> to vector<8x56xf32>
    %cst_46 = arith.constant dense<0.000000e+00> : vector<8x128xf32>
    %211 = tpu.matmul %210, %16, %cst_46 {dimension_numbers = #tpu.dot_dimension_numbers<[1], [0], [0], [1], [0, 0, 1, 1], [], []>} : vector<8x56xf32>, vector<56x128xf32>, vector<8x128xf32> -> vector<8x128xf32>
    %212 = vector.broadcast %24 : vector<1x128xf32> to vector<8x128xf32>
    %213 = arith.addf %211, %212 : vector<8x128xf32>
    %cst_47 = arith.constant dense<0.000000e+00> : vector<8x128xf32>
    %214 = tpu.matmul %184, %20, %cst_47 {dimension_numbers = #tpu.dot_dimension_numbers<[1], [0], [0], [1], [0, 0, 1, 1], [], []>} : vector<8x32xf32>, vector<32x128xf32>, vector<8x128xf32> -> vector<8x128xf32>
    %215 = arith.addf %213, %214 : vector<8x128xf32>
    %216 = arith.negf %215 : vector<8x128xf32>
    %217 = math.exp %216 : vector<8x128xf32>
    %cst_48 = arith.constant 1.000000e+00 : f32
    %218 = vector.broadcast %cst_48 : f32 to vector<8x128xf32>
    %219 = arith.addf %218, %217 : vector<8x128xf32>
    %220 = arith.divf %218, %219 : vector<8x128xf32>
    %221 = arith.mulf %220, %8 : vector<8x128xf32>
    %222 = arith.subf %221, %11 : vector<8x128xf32>
    %223 = vector.extract_strided_slice %222 {offsets = [0, 0], sizes = [8, 32], strides = [1, 1]} : vector<8x128xf32> to vector<8x32xf32>
    %224 = vector.extract_strided_slice %222 {offsets = [0, 32], sizes = [8, 32], strides = [1, 1]} : vector<8x128xf32> to vector<8x32xf32>
    %225 = vector.extract_strided_slice %222 {offsets = [0, 64], sizes = [8, 32], strides = [1, 1]} : vector<8x128xf32> to vector<8x32xf32>
    %226 = vector.extract_strided_slice %222 {offsets = [0, 96], sizes = [8, 32], strides = [1, 1]} : vector<8x128xf32> to vector<8x32xf32>
    %227 = arith.mulf %224, %182 : vector<8x32xf32>
    %228 = arith.mulf %223, %225 : vector<8x32xf32>
    %229 = arith.addf %227, %228 : vector<8x32xf32>
    %230 = math.tanh %229 : vector<8x32xf32>
    %231 = arith.mulf %226, %230 : vector<8x32xf32>
    %cst_49 = arith.constant dense<0.000000e+00> : vector<8x128xf32>
    %232 = tpu.matmul %231, %18, %cst_49 {dimension_numbers = #tpu.dot_dimension_numbers<[1], [0], [0], [1], [0, 0, 1, 1], [], []>} : vector<8x32xf32>, vector<32x128xf32>, vector<8x128xf32> -> vector<8x128xf32>
    %233 = vector.broadcast %26 : vector<1x128xf32> to vector<8x128xf32>
    %234 = arith.addf %232, %233 : vector<8x128xf32>
    %cst_50 = arith.constant dense<0.000000e+00> : vector<8x128xf32>
    %235 = tpu.matmul %205, %22, %cst_50 {dimension_numbers = #tpu.dot_dimension_numbers<[1], [0], [0], [1], [0, 0, 1, 1], [], []>} : vector<8x32xf32>, vector<32x128xf32>, vector<8x128xf32> -> vector<8x128xf32>
    %236 = arith.addf %234, %235 : vector<8x128xf32>
    %237 = arith.negf %236 : vector<8x128xf32>
    %238 = math.exp %237 : vector<8x128xf32>
    %cst_51 = arith.constant 1.000000e+00 : f32
    %239 = vector.broadcast %cst_51 : f32 to vector<8x128xf32>
    %240 = arith.addf %239, %238 : vector<8x128xf32>
    %241 = arith.divf %239, %240 : vector<8x128xf32>
    %242 = arith.mulf %241, %8 : vector<8x128xf32>
    %243 = arith.subf %242, %11 : vector<8x128xf32>
    %244 = vector.extract_strided_slice %243 {offsets = [0, 0], sizes = [8, 32], strides = [1, 1]} : vector<8x128xf32> to vector<8x32xf32>
    %245 = vector.extract_strided_slice %243 {offsets = [0, 32], sizes = [8, 32], strides = [1, 1]} : vector<8x128xf32> to vector<8x32xf32>
    %246 = vector.extract_strided_slice %243 {offsets = [0, 64], sizes = [8, 32], strides = [1, 1]} : vector<8x128xf32> to vector<8x32xf32>
    %247 = vector.extract_strided_slice %243 {offsets = [0, 96], sizes = [8, 32], strides = [1, 1]} : vector<8x128xf32> to vector<8x32xf32>
    %248 = arith.mulf %245, %203 : vector<8x32xf32>
    %249 = arith.mulf %244, %246 : vector<8x32xf32>
    %250 = arith.addf %248, %249 : vector<8x32xf32>
    %251 = math.tanh %250 : vector<8x32xf32>
    %252 = arith.mulf %247, %251 : vector<8x32xf32>
    %253 = vector.extract_strided_slice %27 {offsets = [0, 5], sizes = [8, 1], strides = [1, 1]} : vector<8x8xi32> to vector<8x1xi32>
    %254 = vector.broadcast %253 : vector<8x1xi32> to vector<8x56xi32>
    %255 = arith.cmpi eq, %254, %12 : vector<8x56xi32>
    %256 = arith.extui %255 : vector<8x56xi1> to vector<8x56xi32>
    %257 = arith.sitofp %256 : vector<8x56xi32> to vector<8x56xf32>
    %cst_52 = arith.constant dense<0.000000e+00> : vector<8x128xf32>
    %258 = tpu.matmul %257, %16, %cst_52 {dimension_numbers = #tpu.dot_dimension_numbers<[1], [0], [0], [1], [0, 0, 1, 1], [], []>} : vector<8x56xf32>, vector<56x128xf32>, vector<8x128xf32> -> vector<8x128xf32>
    %259 = vector.broadcast %24 : vector<1x128xf32> to vector<8x128xf32>
    %260 = arith.addf %258, %259 : vector<8x128xf32>
    %cst_53 = arith.constant dense<0.000000e+00> : vector<8x128xf32>
    %261 = tpu.matmul %231, %20, %cst_53 {dimension_numbers = #tpu.dot_dimension_numbers<[1], [0], [0], [1], [0, 0, 1, 1], [], []>} : vector<8x32xf32>, vector<32x128xf32>, vector<8x128xf32> -> vector<8x128xf32>
    %262 = arith.addf %260, %261 : vector<8x128xf32>
    %263 = arith.negf %262 : vector<8x128xf32>
    %264 = math.exp %263 : vector<8x128xf32>
    %cst_54 = arith.constant 1.000000e+00 : f32
    %265 = vector.broadcast %cst_54 : f32 to vector<8x128xf32>
    %266 = arith.addf %265, %264 : vector<8x128xf32>
    %267 = arith.divf %265, %266 : vector<8x128xf32>
    %268 = arith.mulf %267, %8 : vector<8x128xf32>
    %269 = arith.subf %268, %11 : vector<8x128xf32>
    %270 = vector.extract_strided_slice %269 {offsets = [0, 0], sizes = [8, 32], strides = [1, 1]} : vector<8x128xf32> to vector<8x32xf32>
    %271 = vector.extract_strided_slice %269 {offsets = [0, 32], sizes = [8, 32], strides = [1, 1]} : vector<8x128xf32> to vector<8x32xf32>
    %272 = vector.extract_strided_slice %269 {offsets = [0, 64], sizes = [8, 32], strides = [1, 1]} : vector<8x128xf32> to vector<8x32xf32>
    %273 = vector.extract_strided_slice %269 {offsets = [0, 96], sizes = [8, 32], strides = [1, 1]} : vector<8x128xf32> to vector<8x32xf32>
    %274 = arith.mulf %271, %229 : vector<8x32xf32>
    %275 = arith.mulf %270, %272 : vector<8x32xf32>
    %276 = arith.addf %274, %275 : vector<8x32xf32>
    %277 = math.tanh %276 : vector<8x32xf32>
    %278 = arith.mulf %273, %277 : vector<8x32xf32>
    %cst_55 = arith.constant dense<0.000000e+00> : vector<8x128xf32>
    %279 = tpu.matmul %278, %18, %cst_55 {dimension_numbers = #tpu.dot_dimension_numbers<[1], [0], [0], [1], [0, 0, 1, 1], [], []>} : vector<8x32xf32>, vector<32x128xf32>, vector<8x128xf32> -> vector<8x128xf32>
    %280 = vector.broadcast %26 : vector<1x128xf32> to vector<8x128xf32>
    %281 = arith.addf %279, %280 : vector<8x128xf32>
    %cst_56 = arith.constant dense<0.000000e+00> : vector<8x128xf32>
    %282 = tpu.matmul %252, %22, %cst_56 {dimension_numbers = #tpu.dot_dimension_numbers<[1], [0], [0], [1], [0, 0, 1, 1], [], []>} : vector<8x32xf32>, vector<32x128xf32>, vector<8x128xf32> -> vector<8x128xf32>
    %283 = arith.addf %281, %282 : vector<8x128xf32>
    %284 = arith.negf %283 : vector<8x128xf32>
    %285 = math.exp %284 : vector<8x128xf32>
    %cst_57 = arith.constant 1.000000e+00 : f32
    %286 = vector.broadcast %cst_57 : f32 to vector<8x128xf32>
    %287 = arith.addf %286, %285 : vector<8x128xf32>
    %288 = arith.divf %286, %287 : vector<8x128xf32>
    %289 = arith.mulf %288, %8 : vector<8x128xf32>
    %290 = arith.subf %289, %11 : vector<8x128xf32>
    %291 = vector.extract_strided_slice %290 {offsets = [0, 0], sizes = [8, 32], strides = [1, 1]} : vector<8x128xf32> to vector<8x32xf32>
    %292 = vector.extract_strided_slice %290 {offsets = [0, 32], sizes = [8, 32], strides = [1, 1]} : vector<8x128xf32> to vector<8x32xf32>
    %293 = vector.extract_strided_slice %290 {offsets = [0, 64], sizes = [8, 32], strides = [1, 1]} : vector<8x128xf32> to vector<8x32xf32>
    %294 = vector.extract_strided_slice %290 {offsets = [0, 96], sizes = [8, 32], strides = [1, 1]} : vector<8x128xf32> to vector<8x32xf32>
    %295 = arith.mulf %292, %250 : vector<8x32xf32>
    %296 = arith.mulf %291, %293 : vector<8x32xf32>
    %297 = arith.addf %295, %296 : vector<8x32xf32>
    %298 = math.tanh %297 : vector<8x32xf32>
    %299 = arith.mulf %294, %298 : vector<8x32xf32>
    %300 = vector.extract_strided_slice %27 {offsets = [0, 6], sizes = [8, 1], strides = [1, 1]} : vector<8x8xi32> to vector<8x1xi32>
    %301 = vector.broadcast %300 : vector<8x1xi32> to vector<8x56xi32>
    %302 = arith.cmpi eq, %301, %12 : vector<8x56xi32>
    %303 = arith.extui %302 : vector<8x56xi1> to vector<8x56xi32>
    %304 = arith.sitofp %303 : vector<8x56xi32> to vector<8x56xf32>
    %cst_58 = arith.constant dense<0.000000e+00> : vector<8x128xf32>
    %305 = tpu.matmul %304, %16, %cst_58 {dimension_numbers = #tpu.dot_dimension_numbers<[1], [0], [0], [1], [0, 0, 1, 1], [], []>} : vector<8x56xf32>, vector<56x128xf32>, vector<8x128xf32> -> vector<8x128xf32>
    %306 = vector.broadcast %24 : vector<1x128xf32> to vector<8x128xf32>
    %307 = arith.addf %305, %306 : vector<8x128xf32>
    %cst_59 = arith.constant dense<0.000000e+00> : vector<8x128xf32>
    %308 = tpu.matmul %278, %20, %cst_59 {dimension_numbers = #tpu.dot_dimension_numbers<[1], [0], [0], [1], [0, 0, 1, 1], [], []>} : vector<8x32xf32>, vector<32x128xf32>, vector<8x128xf32> -> vector<8x128xf32>
    %309 = arith.addf %307, %308 : vector<8x128xf32>
    %310 = arith.negf %309 : vector<8x128xf32>
    %311 = math.exp %310 : vector<8x128xf32>
    %cst_60 = arith.constant 1.000000e+00 : f32
    %312 = vector.broadcast %cst_60 : f32 to vector<8x128xf32>
    %313 = arith.addf %312, %311 : vector<8x128xf32>
    %314 = arith.divf %312, %313 : vector<8x128xf32>
    %315 = arith.mulf %314, %8 : vector<8x128xf32>
    %316 = arith.subf %315, %11 : vector<8x128xf32>
    %317 = vector.extract_strided_slice %316 {offsets = [0, 0], sizes = [8, 32], strides = [1, 1]} : vector<8x128xf32> to vector<8x32xf32>
    %318 = vector.extract_strided_slice %316 {offsets = [0, 32], sizes = [8, 32], strides = [1, 1]} : vector<8x128xf32> to vector<8x32xf32>
    %319 = vector.extract_strided_slice %316 {offsets = [0, 64], sizes = [8, 32], strides = [1, 1]} : vector<8x128xf32> to vector<8x32xf32>
    %320 = vector.extract_strided_slice %316 {offsets = [0, 96], sizes = [8, 32], strides = [1, 1]} : vector<8x128xf32> to vector<8x32xf32>
    %321 = arith.mulf %318, %276 : vector<8x32xf32>
    %322 = arith.mulf %317, %319 : vector<8x32xf32>
    %323 = arith.addf %321, %322 : vector<8x32xf32>
    %324 = math.tanh %323 : vector<8x32xf32>
    %325 = arith.mulf %320, %324 : vector<8x32xf32>
    %cst_61 = arith.constant dense<0.000000e+00> : vector<8x128xf32>
    %326 = tpu.matmul %325, %18, %cst_61 {dimension_numbers = #tpu.dot_dimension_numbers<[1], [0], [0], [1], [0, 0, 1, 1], [], []>} : vector<8x32xf32>, vector<32x128xf32>, vector<8x128xf32> -> vector<8x128xf32>
    %327 = vector.broadcast %26 : vector<1x128xf32> to vector<8x128xf32>
    %328 = arith.addf %326, %327 : vector<8x128xf32>
    %cst_62 = arith.constant dense<0.000000e+00> : vector<8x128xf32>
    %329 = tpu.matmul %299, %22, %cst_62 {dimension_numbers = #tpu.dot_dimension_numbers<[1], [0], [0], [1], [0, 0, 1, 1], [], []>} : vector<8x32xf32>, vector<32x128xf32>, vector<8x128xf32> -> vector<8x128xf32>
    %330 = arith.addf %328, %329 : vector<8x128xf32>
    %331 = arith.negf %330 : vector<8x128xf32>
    %332 = math.exp %331 : vector<8x128xf32>
    %cst_63 = arith.constant 1.000000e+00 : f32
    %333 = vector.broadcast %cst_63 : f32 to vector<8x128xf32>
    %334 = arith.addf %333, %332 : vector<8x128xf32>
    %335 = arith.divf %333, %334 : vector<8x128xf32>
    %336 = arith.mulf %335, %8 : vector<8x128xf32>
    %337 = arith.subf %336, %11 : vector<8x128xf32>
    %338 = vector.extract_strided_slice %337 {offsets = [0, 0], sizes = [8, 32], strides = [1, 1]} : vector<8x128xf32> to vector<8x32xf32>
    %339 = vector.extract_strided_slice %337 {offsets = [0, 32], sizes = [8, 32], strides = [1, 1]} : vector<8x128xf32> to vector<8x32xf32>
    %340 = vector.extract_strided_slice %337 {offsets = [0, 64], sizes = [8, 32], strides = [1, 1]} : vector<8x128xf32> to vector<8x32xf32>
    %341 = vector.extract_strided_slice %337 {offsets = [0, 96], sizes = [8, 32], strides = [1, 1]} : vector<8x128xf32> to vector<8x32xf32>
    %342 = arith.mulf %339, %297 : vector<8x32xf32>
    %343 = arith.mulf %338, %340 : vector<8x32xf32>
    %344 = arith.addf %342, %343 : vector<8x32xf32>
    %345 = math.tanh %344 : vector<8x32xf32>
    %346 = arith.mulf %341, %345 : vector<8x32xf32>
    %347 = vector.extract_strided_slice %27 {offsets = [0, 7], sizes = [8, 1], strides = [1, 1]} : vector<8x8xi32> to vector<8x1xi32>
    %348 = vector.broadcast %347 : vector<8x1xi32> to vector<8x56xi32>
    %349 = arith.cmpi eq, %348, %12 : vector<8x56xi32>
    %350 = arith.extui %349 : vector<8x56xi1> to vector<8x56xi32>
    %351 = arith.sitofp %350 : vector<8x56xi32> to vector<8x56xf32>
    %cst_64 = arith.constant dense<0.000000e+00> : vector<8x128xf32>
    %352 = tpu.matmul %351, %16, %cst_64 {dimension_numbers = #tpu.dot_dimension_numbers<[1], [0], [0], [1], [0, 0, 1, 1], [], []>} : vector<8x56xf32>, vector<56x128xf32>, vector<8x128xf32> -> vector<8x128xf32>
    %353 = vector.broadcast %24 : vector<1x128xf32> to vector<8x128xf32>
    %354 = arith.addf %352, %353 : vector<8x128xf32>
    %cst_65 = arith.constant dense<0.000000e+00> : vector<8x128xf32>
    %355 = tpu.matmul %325, %20, %cst_65 {dimension_numbers = #tpu.dot_dimension_numbers<[1], [0], [0], [1], [0, 0, 1, 1], [], []>} : vector<8x32xf32>, vector<32x128xf32>, vector<8x128xf32> -> vector<8x128xf32>
    %356 = arith.addf %354, %355 : vector<8x128xf32>
    %357 = arith.negf %356 : vector<8x128xf32>
    %358 = math.exp %357 : vector<8x128xf32>
    %cst_66 = arith.constant 1.000000e+00 : f32
    %359 = vector.broadcast %cst_66 : f32 to vector<8x128xf32>
    %360 = arith.addf %359, %358 : vector<8x128xf32>
    %361 = arith.divf %359, %360 : vector<8x128xf32>
    %362 = arith.mulf %361, %8 : vector<8x128xf32>
    %363 = arith.subf %362, %11 : vector<8x128xf32>
    %364 = vector.extract_strided_slice %363 {offsets = [0, 0], sizes = [8, 32], strides = [1, 1]} : vector<8x128xf32> to vector<8x32xf32>
    %365 = vector.extract_strided_slice %363 {offsets = [0, 32], sizes = [8, 32], strides = [1, 1]} : vector<8x128xf32> to vector<8x32xf32>
    %366 = vector.extract_strided_slice %363 {offsets = [0, 64], sizes = [8, 32], strides = [1, 1]} : vector<8x128xf32> to vector<8x32xf32>
    %367 = vector.extract_strided_slice %363 {offsets = [0, 96], sizes = [8, 32], strides = [1, 1]} : vector<8x128xf32> to vector<8x32xf32>
    %368 = arith.mulf %365, %323 : vector<8x32xf32>
    %369 = arith.mulf %364, %366 : vector<8x32xf32>
    %370 = arith.addf %368, %369 : vector<8x32xf32>
    %371 = math.tanh %370 : vector<8x32xf32>
    %372 = arith.mulf %367, %371 : vector<8x32xf32>
    %cst_67 = arith.constant dense<0.000000e+00> : vector<8x128xf32>
    %373 = tpu.matmul %372, %18, %cst_67 {dimension_numbers = #tpu.dot_dimension_numbers<[1], [0], [0], [1], [0, 0, 1, 1], [], []>} : vector<8x32xf32>, vector<32x128xf32>, vector<8x128xf32> -> vector<8x128xf32>
    %374 = vector.broadcast %26 : vector<1x128xf32> to vector<8x128xf32>
    %375 = arith.addf %373, %374 : vector<8x128xf32>
    %cst_68 = arith.constant dense<0.000000e+00> : vector<8x128xf32>
    %376 = tpu.matmul %346, %22, %cst_68 {dimension_numbers = #tpu.dot_dimension_numbers<[1], [0], [0], [1], [0, 0, 1, 1], [], []>} : vector<8x32xf32>, vector<32x128xf32>, vector<8x128xf32> -> vector<8x128xf32>
    %377 = arith.addf %375, %376 : vector<8x128xf32>
    %378 = arith.negf %377 : vector<8x128xf32>
    %379 = math.exp %378 : vector<8x128xf32>
    %cst_69 = arith.constant 1.000000e+00 : f32
    %380 = vector.broadcast %cst_69 : f32 to vector<8x128xf32>
    %381 = arith.addf %380, %379 : vector<8x128xf32>
    %382 = arith.divf %380, %381 : vector<8x128xf32>
    %383 = arith.mulf %382, %8 : vector<8x128xf32>
    %384 = arith.subf %383, %11 : vector<8x128xf32>
    %385 = vector.extract_strided_slice %384 {offsets = [0, 0], sizes = [8, 32], strides = [1, 1]} : vector<8x128xf32> to vector<8x32xf32>
    %386 = vector.extract_strided_slice %384 {offsets = [0, 32], sizes = [8, 32], strides = [1, 1]} : vector<8x128xf32> to vector<8x32xf32>
    %387 = vector.extract_strided_slice %384 {offsets = [0, 64], sizes = [8, 32], strides = [1, 1]} : vector<8x128xf32> to vector<8x32xf32>
    %388 = vector.extract_strided_slice %384 {offsets = [0, 96], sizes = [8, 32], strides = [1, 1]} : vector<8x128xf32> to vector<8x32xf32>
    %389 = arith.mulf %386, %344 : vector<8x32xf32>
    %390 = arith.mulf %385, %387 : vector<8x32xf32>
    %391 = arith.addf %389, %390 : vector<8x32xf32>
    %392 = math.tanh %391 : vector<8x32xf32>
    %393 = arith.mulf %388, %392 : vector<8x32xf32>
    %c0_70 = arith.constant 0 : index
    %c0_71 = arith.constant 0 : index
    %394 = vector.load %arg6[%c0_70, %c0_71] : memref<32x32xf32, #tpu.memory_space<vmem>>, vector<32x32xf32>
    %cst_72 = arith.constant dense<0.000000e+00> : vector<8x32xf32>
    %395 = tpu.matmul %393, %394, %cst_72 {dimension_numbers = #tpu.dot_dimension_numbers<[1], [0], [0], [1], [0, 0, 1, 1], [], []>} : vector<8x32xf32>, vector<32x32xf32>, vector<8x32xf32> -> vector<8x32xf32>
    %c0_73 = arith.constant 0 : index
    %c0_74 = arith.constant 0 : index
    %396 = vector.load %arg7[%c0_73, %c0_74] : memref<1x32xf32, #tpu.memory_space<vmem>>, vector<1x32xf32>
    %397 = vector.broadcast %396 : vector<1x32xf32> to vector<8x32xf32>
    %398 = arith.addf %395, %397 : vector<8x32xf32>
    %c0_75 = arith.constant 0 : index
    %c0_76 = arith.constant 0 : index
    %399 = vector.load %arg8[%c0_75, %c0_76] : memref<32x4xf32, #tpu.memory_space<vmem>>, vector<32x4xf32>
    %cst_77 = arith.constant dense<0.000000e+00> : vector<8x4xf32>
    %400 = tpu.matmul %398, %399, %cst_77 {dimension_numbers = #tpu.dot_dimension_numbers<[1], [0], [0], [1], [0, 0, 1, 1], [], []>} : vector<8x32xf32>, vector<32x4xf32>, vector<8x4xf32> -> vector<8x4xf32>
    %c0_78 = arith.constant 0 : index
    %c0_79 = arith.constant 0 : index
    %401 = vector.load %arg9[%c0_78, %c0_79] : memref<1x4xf32, #tpu.memory_space<vmem>>, vector<1x4xf32>
    %402 = vector.broadcast %401 : vector<1x4xf32> to vector<8x4xf32>
    %403 = arith.addf %400, %402 : vector<8x4xf32>
    %404 = arith.negf %403 : vector<8x4xf32>
    %405 = math.exp %404 : vector<8x4xf32>
    %cst_80 = arith.constant 1.000000e+00 : f32
    %406 = vector.broadcast %cst_80 : f32 to vector<8x4xf32>
    %407 = arith.addf %406, %405 : vector<8x4xf32>
    %408 = arith.divf %406, %407 : vector<8x4xf32>
    %c0_81 = arith.constant 0 : index
    %c0_82 = arith.constant 0 : index
    %409 = vector.load %arg10[%c0_81, %c0_82] : memref<8x4xf32, #tpu.memory_space<vmem>>, vector<8x4xf32>
    tpu.vector_store %arg10[%c0_81, %c0_82], %408 {strides = array<i32>} : memref<8x4xf32, #tpu.memory_space<vmem>>, vector<8x4xf32>,
    return
  }
  func.func @transform_0(%arg0: i32) -> (i32, i32) {
    %c0_i32 = arith.constant 0 : i32
    %c0_i32_0 = arith.constant 0 : i32
    return %arg0, %c0_i32 : i32, i32
  }
  func.func @transform_1(%arg0: i32) -> (i32, i32) {
    %c0_i32 = arith.constant 0 : i32
    %c0_i32_0 = arith.constant 0 : i32
    %c0_i32_1 = arith.constant 0 : i32
    return %c0_i32, %c0_i32_0 : i32, i32
  }
  func.func @transform_2(%arg0: i32) -> (i32, i32, i32) {
    %c0_i32 = arith.constant 0 : i32
    %c0_i32_0 = arith.constant 0 : i32
    %c0_i32_1 = arith.constant 0 : i32
    %c0_i32_2 = arith.constant 0 : i32
    return %c0_i32, %c0_i32_0, %c0_i32_1 : i32, i32, i32
  }
  func.func @transform_3(%arg0: i32) -> (i32, i32, i32) {
    %c0_i32 = arith.constant 0 : i32
    %c0_i32_0 = arith.constant 0 : i32
    %c0_i32_1 = arith.constant 0 : i32
    %c0_i32_2 = arith.constant 0 : i32
    return %c0_i32, %c0_i32_0, %c0_i32_1 : i32, i32, i32
  }
  func.func @transform_4(%arg0: i32) -> (i32, i32, i32) {
    %c0_i32 = arith.constant 0 : i32
    %c0_i32_0 = arith.constant 0 : i32
    %c0_i32_1 = arith.constant 0 : i32
    %c0_i32_2 = arith.constant 0 : i32
    return %c0_i32, %c0_i32_0, %c0_i32_1 : i32, i32, i32
  }
  func.func @transform_5(%arg0: i32) -> (i32, i32) {
    %c0_i32 = arith.constant 0 : i32
    %c0_i32_0 = arith.constant 0 : i32
    %c0_i32_1 = arith.constant 0 : i32
    return %c0_i32, %c0_i32_0 : i32, i32
  }
  func.func @transform_6(%arg0: i32) -> (i32, i32) {
    %c0_i32 = arith.constant 0 : i32
    %c0_i32_0 = arith.constant 0 : i32
    %c0_i32_1 = arith.constant 0 : i32
    return %c0_i32, %c0_i32_0 : i32, i32
  }
  func.func @transform_7(%arg0: i32) -> (i32, i32) {
    %c0_i32 = arith.constant 0 : i32
    %c0_i32_0 = arith.constant 0 : i32
    %c0_i32_1 = arith.constant 0 : i32
    return %c0_i32, %c0_i32_0 : i32, i32
  }
  func.func @transform_8(%arg0: i32) -> (i32, i32) {
    %c0_i32 = arith.constant 0 : i32
    %c0_i32_0 = arith.constant 0 : i32
    %c0_i32_1 = arith.constant 0 : i32
    return %c0_i32, %c0_i32_0 : i32, i32
  }
  func.func @transform_9(%arg0: i32) -> (i32, i32) {
    %c0_i32 = arith.constant 0 : i32
    %c0_i32_0 = arith.constant 0 : i32
    return %arg0, %c0_i32 : i32, i32
  }
}

</mosaic_0001>

<bundles_post_ra>
// kernel: lstm_forward.1
= control target key start
LH: loop header
LB: loop body
LE: loop exit
PB: predicated region body
PF: predicated region fallthrough
CT: control target
= control target key end

     0   :  { %14 = vsyncpa [#allocation3], 0  ;;  %s4906_s0 = inlined_call_operand.hbm [shape: s32[8,8], index: 0, kind: input, shape index: {}]   ;;  %s4907_s1 = inlined_call_operand.vmem [shape: f32[56,32], index: 1, kind: input, shape index: {}]   ;;  %s4908_s2 = inlined_call_operand.vmem [shape: f32[2,32,128], index: 2, kind: input, shape index: {}]   ;;  %s4909_s3 = inlined_call_operand.vmem [shape: f32[2,32,128], index: 3, kind: input, shape index: {}]   ;;  %s4910_s4 = inlined_call_operand.hbm [shape: f32[2,1,128], index: 4, kind: input, shape index: {}]   ;;  %s4911_s5 = inlined_call_operand.hbm [shape: f32[32,32], index: 5, kind: input, shape index: {}]   ;;  %s4912_s6 = inlined_call_operand.vmem [shape: f32[1,32], index: 6, kind: input, shape index: {}]   ;;  %s4913_s7 = inlined_call_operand.vmem [shape: f32[32,4], index: 7, kind: input, shape index: {}]   ;;  %s4914_s8 = inlined_call_operand.hbm [shape: f32[1,4], index: 8, kind: input, shape index: {}]   ;;  %s4915_s9 = inlined_call_operand.vmem [shape: f32[8,4], index: 9, kind: output, shape index: {}]  }
   0x1   :  { %15 = vsyncpa [#allocation5], 0 }
   0x2   :  { %16 = vsyncpa [#allocation8], 0  ;;  %s4027_s30 = smov [#allocation4]  }
   0x3   :  { %s38_s10 = sshll.u32 %s4027_s30, 4  ;;  %s39_s10 = int_to_ptr.vmem [resolvable:$true] %s38_s10 }
   0x4   :  { %s3949_s11 = scalar_lea.vmem %s39_s10, 32  ;;  %p3954_p1 = scmp.lt.s32.totalorder %s39_s10, %s39_s10 }
   0x5   :  { %p3950_p0 = scmp.ne.s32.totalorder %s39_s10, %s3949_s11  ;;  %p3955_p2 = scmp.lt.s32.totalorder %s3949_s11, %s3949_s11 }
   0x7   :  { %p3956_p3 = por %p3955_p2, %p3954_p1 }
   0x9   :  { %p3957_p4 = pnand %p3956_p3, %p3950_p0 }
   0xb   :  { %3960 = shalt.err (!%p3957_p4)
}
   0xc   :  { %s4028_s12 = smov 16   ;;  %s4029_s13 = smov 1  }
   0xd   :  { %44 = dma.hbm_to_vmem [thread:$0]  %s4910_s4, 32, %s39_s10, [#allocation5], %s4028_s12, %s4028_s12, %s4029_s13  }
   0xe   :  { %s4030_s16 = smov [#allocation2]   ;;  %s4031_s18 = smov [#allocation6]  }
   0xf   :  { %s23_s17 = sshll.u32 %s4030_s16, 4  ;;  %s50_s19 = sshll.u32 %s4031_s18, 4  ;;  %s24_s17 = int_to_ptr.vmem [resolvable:$true] %s23_s17  ;;  %s51_s19 = int_to_ptr.vmem [resolvable:$true] %s50_s19 }
  0x10   :  { %s3969_s20 = scalar_lea.vmem %s24_s17, 128  ;;  %p3974_p6 = scmp.lt.s32.totalorder %s24_s17, %s24_s17 }
  0x11   :  { %p3970_p5 = scmp.ne.s32.totalorder %s24_s17, %s3969_s20  ;;  %p3975_p7 = scmp.lt.s32.totalorder %s3969_s20, %s3969_s20 }
  0x13   :  { %p3976_p8 = por %p3975_p7, %p3974_p6 }
  0x15   :  { %p3977_p9 = pnand %p3976_p8, %p3970_p5 }
  0x17   :  { %3980 = shalt.err (!%p3977_p9)
}
  0x18   :  { %26 = dma.hbm_to_vmem [thread:$0]  %s4906_s0, 128, %s24_s17, [#allocation3]  }
  0x19   :  { %s3989_s23 = scalar_lea.vmem %s51_s19, 512  ;;  %p3994_p11 = scmp.lt.s32.totalorder %s51_s19, %s51_s19 }
  0x1a   :  { %p3990_p10 = scmp.ne.s32.totalorder %s51_s19, %s3989_s23  ;;  %p3995_p12 = scmp.lt.s32.totalorder %s3989_s23, %s3989_s23 }
  0x1c   :  { %p3996_p13 = por %p3995_p12, %p3994_p11 }
  0x1e   :  { %p3997_p0 = pnand %p3996_p13, %p3990_p10 }
  0x20   :  { %4000 = shalt.err (!%p3997_p0)
}
  0x21   :  { %s4032_s4 = smov 128   ;;  %s4033_s24 = smov 8  }
  0x22   :  { %56 = dma.hbm_to_vmem [thread:$0]  %s4911_s5, 512, %s51_s19, [#allocation5], %s4032_s4, %s4032_s4, %s4033_s24  }
  0x23   :  { %s4034_s27 = smov [#allocation7]  }
  0x24   :  { %s67_s28 = sshll.u32 %s4034_s27, 4  ;;  %s68_s28 = int_to_ptr.vmem [resolvable:$true] %s67_s28 }
  0x25   :  { %s4009_s29 = scalar_lea.vmem %s68_s28, 16  ;;  %s4013_s0 = scalar_lea.vmem %s68_s28, 32 }
  0x26   :  { %p4010_p1 = scmp.ne.s32.totalorder %s68_s28, %s4009_s29  ;;  %p4014_p2 = scmp.lt.s32.totalorder %s68_s28, %s68_s28 }
  0x27   :  { %p4015_p3 = scmp.lt.s32.totalorder %s4013_s0, %s4009_s29 }
  0x29   :  { %p4016_p4 = por %p4015_p3, %p4014_p2 }
  0x2b   :  { %p4017_p5 = pnand %p4016_p4, %p4010_p1 }
  0x2d   :  { %4020 = shalt.err (!%p4017_p5)
}
  0x2e   :  { %70 = dma.hbm_to_vmem [thread:$0]  %s4914_s8, 16, %s68_s28, [#allocation8]  }
  0x2f   :  { %4021 = dma.done.wait [#allocation3], 128  }
  0x30   :  { %4022 = vsyncadd [#allocation3], 4294967168 }
  0x31   :  { %4023 = dma.done.wait [#allocation5], 544  }
  0x32   :  { %4024 = vsyncadd [#allocation5], 4294966752 }
  0x33   :  { %4025 = dma.done.wait [#allocation8], 16  }
  0x34   :  { %4026 = vsyncadd [#allocation8], 4294967280  ;;  %v4035_v0 = vmov 0.0   ;;  %vm4036_vm0 = vmmov 0   ;;  %v4037_v1 = vmov 0   ;;  %v100_v2 = vld [vmem:[%s4908_s2 + $0x18] sm:$0xff]  ;;  %v83_v27 = vlaneseq }
  0x35   :  { %3367 = vmatprep.subr.mxu0 %v4035_v0  ;;  %3375 = vmatprep.mubr.msk.f32.mxu0 %vm4036_vm0, %v4035_v0  ;;  %v99_v3 = vld [vmem:[%s4908_s2 + $0x10] sm:$0xff]  ;;  %v98_v4 = vld [vmem:[%s4908_s2 + $0x8] sm:$0xff]  ;;  %v4127_v5 = vld [vmem:[#allocation2] sm:$0xff]  ;;  %vm101_vm1 = vcmask 261120   ;;  %vm253_vm3 = vcmask 457728   ;;  %v4038_v39 = vmov 1.0  }
  0x36   :  { %3818 = vset.pattern.permute.xlu0 %v4037_v1  ;;  %3396 = vmatprep.subr.mxu1 %v4035_v0  ;;  %v97_v6 = vld [vmem:[%s4908_s2] sm:$0xff]  ;;  %v91_v8 = vld [vmem:[%s4907_s1 + $0x8] sm:$0xff]  ;;  %v92_v9 = vld [vmem:[%s4907_s1 + $0x10] sm:$0xff]  ;;  %v4200_v29 = vand.u32 127, %v83_v27  ;;  %v4040_v45 = vmov 1   ;;  %s4041_s14 = smov 96  }
  0x37   :  { %3410 = vmatprep.mubr.msk.f32.mxu1 %vm4036_vm0, %v4035_v0  ;;  %3368 = vmatpush3.msra.mxu0 %v100_v2  ;;  %v90_v7 = vld [vmem:[%s4907_s1] sm:$0xff]  ;;  %v93_v10 = vld [vmem:[%s4907_s1 + $0x18] sm:$0xff]  ;;  %v95_v12 = vld [vmem:[%s4907_s1 + $0x28] sm:$0xff]  ;;  %s4042_s15 = smov 32   ;;  %vm3087_vm14 = vcmask 31744  }
  0x38   :  { %3369 = vmatprep.subr.mxu0 %v4035_v0  ;;  %242 = vperm.xlu0 %3818, %v4127_v5   ;;  %v94_v11 = vld [vmem:[%s4907_s1 + $0x20] sm:$0xff]  ;;  %v96_v13 = vld [vmem:[%s4907_s1 + $0x30] sm:$0xff]  ;;  %v4227_v32 = vld [vmem:[#allocation4] ss:$0 sm:$0xff]  ;;  %vm85_vm4 = vcmp.ge.s32.totalorder %v4200_v29, 64  ;;  %vm86_vm5 = vcmp.lt.s32.totalorder %v4200_v29, 96 }
  0x39   :  { %3370 = vmatpush3.msra.mxu0 %v99_v3  ;;  %vm87_vm6 = vmand %vm85_vm4, %vm86_vm5  ;;  %s4039_s1 = smov 64   ;;  %3819 = vset.pattern.permute.xlu1 %v4040_v45  ;;  %v4243_v48 = vld [vmem:[%s4908_s2 + $0x38] sm:$0xff]  ;;  %v4248_v49 = vld [vmem:[%s4908_s2 + $0x30] sm:$0xff] }
  0x3a   :  { %3371 = vmatprep.subr.mxu0 %v4035_v0  ;;  %v4232_v40 = vsel %vm87_vm6, 2.0, %v4038_v39  ;;  %v4235_v42 = vsel %vm87_vm6, 1.0, %v4035_v0  ;;  %v4255_v50 = vld [vmem:[%s4908_s2 + $0x28] sm:$0xff]  ;;  %v4262_v51 = vld [vmem:[%s4908_s2 + $0x20] sm:$0xff]  ;;  %v4280_v57 = vld [vmem:[%s4909_s3 + $0x18] sm:$0xff] }
  0x3b   :  { %3372 = vmatpush3.msra.mxu0 %v98_v4  ;;  %v4286_v59 = vld [vmem:[%s4909_s3 + $0x10] sm:$0xff]  ;;  %v4295_v60 = vld [vmem:[%s4909_s3 + $0x8] sm:$0xff]  ;;  %v4302_v61 = vld [vmem:[%s4909_s3] sm:$0xff] }
  0x3c   :  { %3373 = vmatprep.subr.mxu0 %v4035_v0  ;;  %v4319_v1 = vld [vmem:[#allocation4 + $0x1] ss:$0 sm:$0xff] }
  0x3d   :  { %3374 = vmatpush3.msra.mxu0 %v97_v6 }
  0x3e   :  { %3376 = vmatmul.mubr.msk.f32.vlgmr.msra.gmra.mxu0 %vm101_vm1, %v90_v7  ;;  %3424 = vmatprep.subr.mxu0 %v4035_v0 }
  0x3f   :  { %3378 = vmatprep.mubr.msk.f32.mxu0 %vm4036_vm0, %v4035_v0 }
  0x42   :  { %3379 = vmatmul.mubr.msk.f32.gmra.mxu0 %vm101_vm1, %v91_v8 }
  0x43   :  { %3381 = vmatprep.mubr.msk.f32.mxu0 %vm4036_vm0, %v4035_v0 }
  0x46   :  { %3382 = vmatmul.mubr.msk.f32.gmra.mxu0 %vm101_vm1, %v92_v9 }
  0x47   :  { %3384 = vmatprep.mubr.msk.f32.mxu0 %vm4036_vm0, %v4035_v0 }
  0x4a   :  { %3385 = vmatmul.mubr.msk.f32.gmra.mxu0 %vm101_vm1, %v93_v10 }
  0x4b   :  { %3387 = vmatprep.mubr.msk.f32.mxu0 %vm4036_vm0, %v4035_v0 }
  0x4e   :  { %3388 = vmatmul.mubr.msk.f32.gmra.mxu0 %vm101_vm1, %v94_v11 }
  0x4f   :  { %3390 = vmatprep.mubr.msk.f32.mxu0 %vm4036_vm0, %v4035_v0 }
  0x52   :  { %3391 = vmatmul.mubr.msk.f32.gmra.mxu0 %vm101_vm1, %v95_v12 }
  0x53   :  { %3393 = vmatprep.mubr.msk.f32.mxu0 %vm4036_vm0, %v4035_v0 }
  0x56   :  { %3394 = vmatmul.mubr.msk.f32.gmra.mxu0 %vm101_vm1, %v96_v13 }
  0x57   :  { %3438 = vmatprep.mubr.msk.f32.mxu0 %vm4036_vm0, %v4035_v0 }
  0xb3   :  { %v243_v30 = vpop.permute.xlu0 %242 }
  0xb4   :  { %vm244_vm2 = vcmp.eq.s32.totalorder %v243_v30, %v4200_v29 }
  0xb5   :  { %v3111_v31 = vsel %vm244_vm2, 1.0, %v4035_v0 }
  0xfe   :  { %v4178_v14 = vpop.f32.mrf.mxu0 }
 0x100   :  { %v3377_v15 = vpop.f32.mrf.mxu0 }
 0x102   :  { %v4180_v16 = vpop.f32.mrf.mxu0 }
 0x104   :  { %v3380_v17 = vpop.f32.mrf.mxu0 }
 0x106   :  { %v4182_v18 = vpop.f32.mrf.mxu0 }
 0x108   :  { %v3383_v19 = vpop.f32.mrf.mxu0 }
 0x10a   :  { %v4184_v20 = vpop.f32.mrf.mxu0 }
 0x10c   :  { %v3386_v21 = vpop.f32.mrf.mxu0 }
 0x10e   :  { %v4186_v22 = vpop.f32.mrf.mxu0 }
 0x110   :  { %v3389_v23 = vpop.f32.mrf.mxu0 }
 0x112   :  { %v4188_v24 = vpop.f32.mrf.mxu0 }
 0x114   :  { %v3392_v25 = vpop.f32.mrf.mxu0 }
 0x116   :  { %v4190_v26 = vpop.f32.mrf.mxu0 }
 0x117   :  { %3397 = vmatpush3.msra.mxu1 %v4190_v26  ;;  %3425 = vmatpush3.msra.mxu0 %v4190_v26 }
 0x118   :  { %v3395_v28 = vpop.f32.mrf.mxu0  ;;  %3398 = vmatprep.subr.mxu1 %v4035_v0  ;;  %3426 = vmatprep.subr.mxu0 %v4035_v0 }
 0x119   :  { %3399 = vmatpush3.msra.mxu1 %v4188_v24  ;;  %3427 = vmatpush3.msra.mxu0 %v4188_v24 }
 0x11a   :  { %3400 = vmatprep.subr.mxu1 %v4035_v0  ;;  %3428 = vmatprep.subr.mxu0 %v4035_v0 }
 0x11b   :  { %3401 = vmatpush3.msra.mxu1 %v4186_v22  ;;  %3429 = vmatpush3.msra.mxu0 %v4186_v22 }
 0x11c   :  { %3402 = vmatprep.subr.mxu1 %v4035_v0  ;;  %3430 = vmatprep.subr.mxu0 %v4035_v0 }
 0x11d   :  { %3403 = vmatpush3.msra.mxu1 %v4184_v20  ;;  %3431 = vmatpush3.msra.mxu0 %v4184_v20 }
 0x11e   :  { %3404 = vmatprep.subr.mxu1 %v4035_v0  ;;  %3432 = vmatprep.subr.mxu0 %v4035_v0 }
 0x11f   :  { %3405 = vmatpush3.msra.mxu1 %v4182_v18  ;;  %3433 = vmatpush3.msra.mxu0 %v4182_v18 }
 0x120   :  { %3406 = vmatprep.subr.mxu1 %v4035_v0  ;;  %3434 = vmatprep.subr.mxu0 %v4035_v0 }
 0x121   :  { %3407 = vmatpush3.msra.mxu1 %v4180_v16  ;;  %3435 = vmatpush3.msra.mxu0 %v4180_v16 }
 0x122   :  { %3408 = vmatprep.subr.mxu1 %v4035_v0  ;;  %3436 = vmatprep.subr.mxu0 %v4035_v0 }
 0x123   :  { %3409 = vmatpush3.msra.mxu1 %v4178_v14  ;;  %3437 = vmatpush3.msra.mxu0 %v4178_v14 }
 0x124   :  { %3411 = vmatmul.mubr.msk.f32.vlgmr.msra.gmra.mxu1 %vm253_vm3, %v3111_v31  ;;  %3413 = vmatprep.subr.mxu1 %v4035_v0 }
 0x125   :  { %3421 = vmatprep.mubr.msk.f32.mxu1 %vm4036_vm0, %v4035_v0  ;;  %3463 = vmatprep.subr.mxu0 %v4035_v0 }
 0x126   :  { %3414 = vmatpush3.msra.mxu1 %v4243_v48 }
 0x127   :  { %3415 = vmatprep.subr.mxu1 %v4035_v0 }
 0x128   :  { %3416 = vmatpush3.msra.mxu1 %v4248_v49 }
 0x129   :  { %3417 = vmatprep.subr.mxu1 %v4035_v0 }
 0x12a   :  { %3418 = vmatpush3.msra.mxu1 %v4255_v50 }
 0x12b   :  { %3419 = vmatprep.subr.mxu1 %v4035_v0 }
 0x12c   :  { %3420 = vmatpush3.msra.mxu1 %v4262_v51 }
 0x12d   :  { %3441 = vmatprep.subr.mxu1 %v4035_v0 }
 0x1e4   :  { %v323_v33 = vpop.f32.mrf.mxu1 }
 0x1e5   :  { %v324_v34 = vadd.f32 %v4227_v32, %v323_v33 }
 0x1e6   :  { %v3412_v35 = vpop.f32.mrf.mxu1 }
 0x1e7   :  { %v3114_v36 = vmul.f32 -1.442695, %v324_v34 }
 0x1e9   :  { %3826 = vpow2.f32 %v3114_v36 }
 0x1f6   :  { %v3827_v37 = vpop.eup %3826 }
 0x1f7   :  { %v330_v38 = vadd.f32 1.0, %v3827_v37 }
 0x1f9   :  { %3828 = vrcp.f32 %v330_v38 }
 0x206   :  { %v3829_v41 = vpop.eup %3828 }
 0x207   :  { %v333_v43 = vmul.f32 %v3829_v41, %v4232_v40  ;;  %v4043_v41 = vmov 2  }
 0x208   :  { %3820 = vset.pattern.permute.xlu0 %v4043_v41 }
 0x209   :  { %v334_v44 = vsub.f32 %v333_v43, %v4235_v42  ;;  %v4341_v43 = vld [vmem:[%s4909_s3 + $0x38] sm:$0xff] }
 0x20b   :  { %336 = vrot.lane.b32.xlu0 %v334_v44, %s4039_s1 }
 0x27d   :  { %v337_v46 = vpop.permute.xlu0 %336 }
 0x27e   :  { %v339_v47 = vmul.f32 %v337_v46, %v334_v44  ;;  %v4356_v46 = vld [vmem:[%s4909_s3 + $0x28] sm:$0xff] }
 0x280   :  { %3830 = vtanh.f32 %v339_v47 }
 0x28d   :  { %v3831_v52 = vpop.eup %3830 }
 0x28e   :  { %342 = vrot.lane.b32.xlu1 %v3831_v52, %s4041_s14 }
 0x292   :  { %447 = vperm.xlu1 %3819, %v4127_v5  }
 0x300   :  { %v343_v53 = vpop.permute.xlu1 %342 }
 0x301   :  { %v345_v54 = vmul.f32 %v343_v53, %v334_v44  ;;  %v4346_v44 = vld [vmem:[%s4909_s3 + $0x30] sm:$0xff] }
 0x303   :  { %353 = vrot.lane.b32.xlu0 %v345_v54, %s4042_s15 }
 0x307   :  { %605 = vrot.lane.b32.xlu0 %v339_v47, %s4042_s15  ;;  %v4363_v47 = vld [vmem:[%s4909_s3 + $0x20] sm:$0xff] }
 0x30d   :  { %v448_v55 = vpop.permute.xlu1 %447 }
 0x30e   :  { %vm449_vm7 = vcmp.eq.s32.totalorder %v448_v55, %v4200_v29 }
 0x30f   :  { %v3118_v56 = vsel %vm449_vm7, 1.0, %v4035_v0 }
 0x310   :  { %3439 = vmatmul.mubr.msk.f32.vlgmr.msra.gmra.mxu0 %vm253_vm3, %v3118_v56 }
 0x311   :  { %3471 = vmatprep.mubr.msk.f32.mxu0 %vm4036_vm0, %v4035_v0  ;;  %3464 = vmatpush3.msra.mxu0 %v4341_v43 }
 0x312   :  { %3465 = vmatprep.subr.mxu0 %v4035_v0 }
 0x313   :  { %3466 = vmatpush3.msra.mxu0 %v4346_v44 }
 0x314   :  { %3467 = vmatprep.subr.mxu0 %v4035_v0 }
 0x315   :  { %3468 = vmatpush3.msra.mxu0 %v4356_v46 }
 0x316   :  { %3469 = vmatprep.subr.mxu0 %v4035_v0 }
 0x317   :  { %3470 = vmatpush3.msra.mxu0 %v4363_v47 }
 0x318   :  { %3491 = vmatprep.subr.mxu0 %v4035_v0 }
 0x375   :  { %v354_v58 = vpop.permute.xlu0 %353 }
 0x376   :  { %3422 = vmatmul.mubr.msk.f32.vlgmr.msra.gmra.mxu1 %vm101_vm1, %v354_v58 }
 0x377   :  { %3442 = vmatpush3.msra.mxu1 %v4280_v57  ;;  %3449 = vmatprep.mubr.msk.f32.mxu1 %vm4036_vm0, %v4035_v0 }
 0x378   :  { %3443 = vmatprep.subr.mxu1 %v4035_v0 }
 0x379   :  { %3444 = vmatpush3.msra.mxu1 %v4286_v59  ;;  %v606_v30 = vpop.permute.xlu0 %605 }
 0x37a   :  { %3445 = vmatprep.subr.mxu1 %v4035_v0 }
 0x37b   :  { %3446 = vmatpush3.msra.mxu1 %v4295_v60 }
 0x37c   :  { %3447 = vmatprep.subr.mxu1 %v4035_v0 }
 0x37d   :  { %3448 = vmatpush3.msra.mxu1 %v4302_v61 }
 0x37e   :  { %3450 = vmatmul.mubr.msk.f32.vlgmr.msra.gmra.mxu1 %vm101_vm1, %v354_v58  ;;  %3452 = vmatprep.subr.mxu1 %v4035_v0 }
 0x37f   :  { %3453 = vmatpush3.msra.mxu1 %v4243_v48  ;;  %3460 = vmatprep.mubr.msk.f32.mxu1 %vm4036_vm0, %v4035_v0 }
 0x380   :  { %3454 = vmatprep.subr.mxu1 %v4035_v0 }
 0x381   :  { %3455 = vmatpush3.msra.mxu1 %v4248_v49 }
 0x382   :  { %3456 = vmatprep.subr.mxu1 %v4035_v0 }
 0x383   :  { %3457 = vmatpush3.msra.mxu1 %v4255_v50 }
 0x384   :  { %3458 = vmatprep.subr.mxu1 %v4035_v0 }
 0x385   :  { %3459 = vmatpush3.msra.mxu1 %v4262_v51 }
 0x386   :  { %3474 = vmatprep.subr.mxu1 %v4035_v0 }
 0x3d0   :  { %v521_v62 = vpop.f32.mrf.mxu0 }
 0x3d1   :  { %v522_v7 = vadd.f32 %v4227_v32, %v521_v62 }
 0x3d2   :  { %v3440_v63 = vpop.f32.mrf.mxu0 }
 0x436   :  { %v423_v2 = vpop.f32.mrf.mxu1 }
 0x437   :  { %v424_v3 = vadd.f32 %v4319_v1, %v423_v2 }
 0x438   :  { %v3423_v4 = vpop.f32.mrf.mxu1 }
 0x439   :  { %v3117_v6 = vmul.f32 -1.442695, %v424_v3 }
 0x43b   :  { %3832 = vpow2.f32 %v3117_v6 }
 0x43e   :  { %v591_v8 = vpop.f32.mrf.mxu1 }
 0x43f   :  { %v595_v9 = vadd.f32 %v591_v8, %v522_v7 }
 0x440   :  { %v3451_v10 = vpop.f32.mrf.mxu1 }
 0x441   :  { %v3121_v11 = vmul.f32 -1.442695, %v595_v9 }
 0x443   :  { %3834 = vpow2.f32 %v3121_v11 }
 0x448   :  { %v3833_v12 = vpop.eup %3832 }
 0x449   :  { %v430_v13 = vadd.f32 1.0, %v3833_v12 }
 0x44b   :  { %3836 = vrcp.f32 %v430_v13 }
 0x450   :  { %v3835_v15 = vpop.eup %3834 }
 0x451   :  { %v599_v17 = vadd.f32 1.0, %v3835_v15 }
 0x453   :  { %3838 = vrcp.f32 %v599_v17 }
 0x458   :  { %v3837_v19 = vpop.eup %3836 }
 0x459   :  { %v433_v21 = vmul.f32 %v3837_v19, %v4232_v40 }
 0x45b   :  { %v434_v23 = vsub.f32 %v433_v21, %v4235_v42 }
 0x45d   :  { %436 = vrot.lane.b32.xlu0 %v434_v23, %s4039_s1 }
 0x460   :  { %v3839_v25 = vpop.eup %3838 }
 0x461   :  { %v602_v27 = vmul.f32 %v3839_v25, %v4232_v40 }
 0x463   :  { %v603_v28 = vsub.f32 %v602_v27, %v4235_v42 }
 0x465   :  { %610 = vrot.lane.b32.xlu1 %v603_v28, %s4039_s1  ;;  %v608_v37 = vmul.f32 %v606_v30, %v603_v28 }
 0x4cf   :  { %v437_v31 = vpop.permute.xlu0 %436 }
 0x4d0   :  { %v4329_v33 = vmul.f32 %v437_v31, %v434_v23 }
 0x4d2   :  { %3840 = vtanh.f32 %v4329_v33 }
 0x4d7   :  { %v611_v34 = vpop.permute.xlu1 %610 }
 0x4d8   :  { %v613_v35 = vmul.f32 %v611_v34, %v603_v28 }
 0x4da   :  { %615 = vrot.lane.b32.xlu1 %v613_v35, %s4042_s15 }
 0x4df   :  { %v3841_v36 = vpop.eup %3840 }
 0x4e0   :  { %442 = vrot.lane.b32.xlu0 %v3841_v36, %s4041_s14 }
 0x4e4   :  { %806 = vperm.xlu0 %3820, %v4127_v5  }
 0x54c   :  { %v616_v38 = vpop.permute.xlu1 %615 }
 0x54d   :  { %v4334_v39 = vadd.f32 %v616_v38, %v608_v37 }
 0x54f   :  { %3842 = vtanh.f32 %v4334_v39 }
 0x552   :  { %v443_v54 = vpop.permute.xlu0 %442 }
 0x553   :  { %v445_v55 = vmul.f32 %v443_v54, %v434_v23 }
 0x55c   :  { %v3843_v45 = vpop.eup %3842 }
 0x55d   :  { %621 = vrot.lane.b32.xlu1 %v3843_v45, %s4039_s1 }
 0x55f   :  { %v807_v62 = vpop.permute.xlu0 %806 }
 0x560   :  { %vm808_vm8 = vcmp.eq.s32.totalorder %v807_v62, %v4200_v29  ;;  %v4044_v62 = vmov 3  }
 0x561   :  { %v3125_v63 = vsel %vm808_vm8, 1.0, %v4035_v0  ;;  %3821 = vset.pattern.permute.xlu1 %v4044_v62 }
 0x5cf   :  { %v622_v52 = vpop.permute.xlu1 %621 }
 0x5d0   :  { %v624_v53 = vmul.f32 %v622_v52, %v603_v28 }
 0x5d2   :  { %626 = vrot.lane.b32.xlu1 %v624_v53, %s4042_s15 }
 0x5d6   :  { %701 = vrot.lane.b32.xlu1 %v445_v55, %s4042_s15 }
 0x644   :  { %v627_v56 = vpop.permute.xlu1 %626 }
 0x645   :  { %3461 = vmatmul.mubr.msk.f32.vlgmr.msra.gmra.mxu1 %vm101_vm1, %v627_v56 }
 0x646   :  { %3475 = vmatpush3.msra.mxu1 %v4190_v26  ;;  %3488 = vmatprep.mubr.msk.f32.mxu1 %vm4036_vm0, %v4035_v0 }
 0x647   :  { %3476 = vmatprep.subr.mxu1 %v4035_v0 }
 0x648   :  { %3477 = vmatpush3.msra.mxu1 %v4188_v24  ;;  %v702_v58 = vpop.permute.xlu1 %701 }
 0x649   :  { %3478 = vmatprep.subr.mxu1 %v4035_v0  ;;  %3472 = vmatmul.mubr.msk.f32.vlgmr.msra.gmra.mxu0 %vm101_vm1, %v702_v58 }
 0x64a   :  { %3479 = vmatpush3.msra.mxu1 %v4186_v22  ;;  %3492 = vmatpush3.msra.mxu0 %v4280_v57 }
 0x64b   :  { %3480 = vmatprep.subr.mxu1 %v4035_v0  ;;  %3493 = vmatprep.subr.mxu0 %v4035_v0 }
 0x64c   :  { %3481 = vmatpush3.msra.mxu1 %v4184_v20  ;;  %3494 = vmatpush3.msra.mxu0 %v4286_v59 }
 0x64d   :  { %3482 = vmatprep.subr.mxu1 %v4035_v0  ;;  %3495 = vmatprep.subr.mxu0 %v4035_v0 }
 0x64e   :  { %3483 = vmatpush3.msra.mxu1 %v4182_v18  ;;  %3496 = vmatpush3.msra.mxu0 %v4295_v60 }
 0x64f   :  { %3484 = vmatprep.subr.mxu1 %v4035_v0  ;;  %3497 = vmatprep.subr.mxu0 %v4035_v0 }
 0x650   :  { %3485 = vmatpush3.msra.mxu1 %v4180_v16  ;;  %3498 = vmatpush3.msra.mxu0 %v4302_v61 }
 0x651   :  { %3499 = vmatprep.mubr.msk.f32.mxu0 %vm4036_vm0, %v4035_v0  ;;  %3486 = vmatprep.subr.mxu1 %v4035_v0 }
 0x652   :  { %3500 = vmatmul.mubr.msk.f32.vlgmr.msra.gmra.mxu0 %vm101_vm1, %v627_v56  ;;  %3487 = vmatpush3.msra.mxu1 %v4178_v14 }
 0x653   :  { %3489 = vmatmul.mubr.msk.f32.vlgmr.msra.gmra.mxu1 %vm253_vm3, %v3125_v63  ;;  %3502 = vmatprep.subr.mxu0 %v4035_v0 }
 0x654   :  { %3503 = vmatpush3.msra.mxu0 %v4243_v48  ;;  %3513 = vmatprep.subr.mxu1 %v4035_v0 }
 0x655   :  { %3504 = vmatprep.subr.mxu0 %v4035_v0  ;;  %3514 = vmatpush3.msra.mxu1 %v4341_v43 }
 0x656   :  { %3505 = vmatpush3.msra.mxu0 %v4248_v49  ;;  %3515 = vmatprep.subr.mxu1 %v4035_v0 }
 0x657   :  { %3506 = vmatprep.subr.mxu0 %v4035_v0  ;;  %3516 = vmatpush3.msra.mxu1 %v4346_v44 }
 0x658   :  { %3507 = vmatpush3.msra.mxu0 %v4255_v50  ;;  %3510 = vmatprep.mubr.msk.f32.mxu0 %vm4036_vm0, %v4035_v0 }
 0x659   :  { %3508 = vmatprep.subr.mxu0 %v4035_v0  ;;  %3517 = vmatprep.subr.mxu1 %v4035_v0 }
 0x65a   :  { %3509 = vmatpush3.msra.mxu0 %v4262_v51  ;;  %3518 = vmatpush3.msra.mxu1 %v4356_v46 }
 0x65b   :  { %3524 = vmatprep.subr.mxu0 %v4035_v0  ;;  %3519 = vmatprep.subr.mxu1 %v4035_v0 }
 0x65c   :  { %3520 = vmatpush3.msra.mxu1 %v4363_v47  ;;  %3521 = vmatprep.mubr.msk.f32.mxu1 %vm4036_vm0, %v4035_v0 }
 0x65d   :  { %3541 = vmatprep.subr.mxu1 %v4035_v0 }
 0x705   :  { %v696_v2 = vpop.f32.mrf.mxu1 }
 0x706   :  { %v697_v4 = vadd.f32 %v4319_v1, %v696_v2 }
 0x707   :  { %v3462_v3 = vpop.f32.mrf.mxu1 }
 0x709   :  { %v771_v6 = vpop.f32.mrf.mxu0 }
 0x70a   :  { %v775_v7 = vadd.f32 %v771_v6, %v697_v4 }
 0x70b   :  { %v3473_v8 = vpop.f32.mrf.mxu0 }
 0x70c   :  { %v3124_v9 = vmul.f32 -1.442695, %v775_v7 }
 0x70e   :  { %3844 = vpow2.f32 %v3124_v9 }
 0x712   :  { %v950_v10 = vpop.f32.mrf.mxu0 }
 0x713   :  { %v880_v11 = vpop.f32.mrf.mxu1 }
 0x714   :  { %v881_v12 = vadd.f32 %v4227_v32, %v880_v11  ;;  %v3501_v13 = vpop.f32.mrf.mxu0 }
 0x715   :  { %v3490_v15 = vpop.f32.mrf.mxu1 }
 0x716   :  { %v954_v17 = vadd.f32 %v950_v10, %v881_v12 }
 0x718   :  { %v3128_v19 = vmul.f32 -1.442695, %v954_v17 }
 0x71a   :  { %3846 = vpow2.f32 %v3128_v19 }
 0x71b   :  { %v3845_v21 = vpop.eup %3844 }
 0x71c   :  { %v779_v23 = vadd.f32 1.0, %v3845_v21 }
 0x71e   :  { %3848 = vrcp.f32 %v779_v23 }
 0x727   :  { %v3847_v25 = vpop.eup %3846 }
 0x728   :  { %v958_v27 = vadd.f32 1.0, %v3847_v25 }
 0x72a   :  { %3850 = vrcp.f32 %v958_v27 }
 0x72b   :  { %v3849_v28 = vpop.eup %3848 }
 0x72c   :  { %v782_v30 = vmul.f32 %v3849_v28, %v4232_v40 }
 0x72e   :  { %v783_v31 = vsub.f32 %v782_v30, %v4235_v42 }
 0x730   :  { %790 = vrot.lane.b32.xlu0 %v783_v31, %s4039_s1 }
 0x734   :  { %785 = vrot.lane.b32.xlu0 %v4329_v33, %s4042_s15 }
 0x737   :  { %v3851_v34 = vpop.eup %3850 }
 0x738   :  { %v961_v35 = vmul.f32 %v3851_v34, %v4232_v40 }
 0x73a   :  { %v962_v36 = vsub.f32 %v961_v35, %v4235_v42 }
 0x73c   :  { %965 = vrot.lane.b32.xlu1 %v962_v36, %s4039_s1  ;;  %v963_v52 = vmul.f32 %v962_v36, %v4334_v39 }
 0x7a2   :  { %v791_v41 = vpop.permute.xlu0 %790 }
 0x7a3   :  { %v793_v45 = vmul.f32 %v791_v41, %v783_v31 }
 0x7a6   :  { %v786_v53 = vpop.permute.xlu0 %785 }
 0x7a7   :  { %v788_v55 = vmul.f32 %v786_v53, %v783_v31 }
 0x7ae   :  { %v966_v37 = vpop.permute.xlu1 %965 }
 0x7af   :  { %v968_v38 = vmul.f32 %v966_v37, %v962_v36 }
 0x7b1   :  { %970 = vrot.lane.b32.xlu1 %v968_v38, %s4042_s15 }
 0x7b5   :  { %795 = vrot.lane.b32.xlu1 %v793_v45, %s4042_s15 }
 0x823   :  { %v971_v54 = vpop.permute.xlu1 %970 }
 0x824   :  { %v4434_v33 = vadd.f32 %v971_v54, %v963_v52 }
 0x826   :  { %3852 = vtanh.f32 %v4434_v33 }
 0x827   :  { %v796_v56 = vpop.permute.xlu1 %795 }
 0x828   :  { %v4437_v58 = vadd.f32 %v796_v56, %v788_v55 }
 0x82a   :  { %3854 = vtanh.f32 %v4437_v58 }
 0x833   :  { %v3853_v63 = vpop.eup %3852 }
 0x834   :  { %976 = vrot.lane.b32.xlu0 %v3853_v63, %s4039_s1 }
 0x837   :  { %v3855_v2 = vpop.eup %3854 }
 0x838   :  { %801 = vrot.lane.b32.xlu1 %v3855_v2, %s4039_s1 }
 0x83c   :  { %1157 = vperm.xlu1 %3821, %v4127_v5  }
 0x8a6   :  { %v977_v39 = vpop.permute.xlu0 %976 }
 0x8a7   :  { %v979_v3 = vmul.f32 %v977_v39, %v962_v36 }
 0x8a9   :  { %981 = vrot.lane.b32.xlu0 %v979_v3, %s4042_s15 }
 0x8aa   :  { %v802_v4 = vpop.permute.xlu1 %801 }
 0x8ab   :  { %v804_v6 = vmul.f32 %v802_v4, %v783_v31 }
 0x8ad   :  { %1056 = vrot.lane.b32.xlu0 %v804_v6, %s4042_s15 }
 0x8b7   :  { %v1158_v9 = vpop.permute.xlu1 %1157 }
 0x8b8   :  { %vm1159_vm9 = vcmp.eq.s32.totalorder %v1158_v9, %v4200_v29 }
 0x8b9   :  { %v3132_v10 = vsel %vm1159_vm9, 1.0, %v4035_v0 }
 0x91b   :  { %v982_v7 = vpop.permute.xlu0 %981 }
 0x91c   :  { %3511 = vmatmul.mubr.msk.f32.vlgmr.msra.gmra.mxu0 %vm101_vm1, %v982_v7 }
 0x91d   :  { %3525 = vmatpush3.msra.mxu0 %v4190_v26  ;;  %3538 = vmatprep.mubr.msk.f32.mxu0 %vm4036_vm0, %v4035_v0 }
 0x91e   :  { %3526 = vmatprep.subr.mxu0 %v4035_v0 }
 0x91f   :  { %3527 = vmatpush3.msra.mxu0 %v4188_v24  ;;  %v1057_v8 = vpop.permute.xlu0 %1056 }
 0x920   :  { %3528 = vmatprep.subr.mxu0 %v4035_v0  ;;  %3522 = vmatmul.mubr.msk.f32.vlgmr.msra.gmra.mxu1 %vm101_vm1, %v1057_v8 }
 0x921   :  { %3529 = vmatpush3.msra.mxu0 %v4186_v22  ;;  %3542 = vmatpush3.msra.mxu1 %v4280_v57 }
 0x922   :  { %3530 = vmatprep.subr.mxu0 %v4035_v0  ;;  %3543 = vmatprep.subr.mxu1 %v4035_v0 }
 0x923   :  { %3531 = vmatpush3.msra.mxu0 %v4184_v20  ;;  %3544 = vmatpush3.msra.mxu1 %v4286_v59 }
 0x924   :  { %3532 = vmatprep.subr.mxu0 %v4035_v0  ;;  %3545 = vmatprep.subr.mxu1 %v4035_v0 }
 0x925   :  { %3533 = vmatpush3.msra.mxu0 %v4182_v18  ;;  %3546 = vmatpush3.msra.mxu1 %v4295_v60 }
 0x926   :  { %3534 = vmatprep.subr.mxu0 %v4035_v0  ;;  %3547 = vmatprep.subr.mxu1 %v4035_v0 }
 0x927   :  { %3535 = vmatpush3.msra.mxu0 %v4180_v16  ;;  %3548 = vmatpush3.msra.mxu1 %v4302_v61 }
 0x928   :  { %3549 = vmatprep.mubr.msk.f32.mxu1 %vm4036_vm0, %v4035_v0  ;;  %3536 = vmatprep.subr.mxu0 %v4035_v0 }
 0x929   :  { %3550 = vmatmul.mubr.msk.f32.vlgmr.msra.gmra.mxu1 %vm101_vm1, %v982_v7  ;;  %3537 = vmatpush3.msra.mxu0 %v4178_v14 }
 0x92a   :  { %3539 = vmatmul.mubr.msk.f32.vlgmr.msra.gmra.mxu0 %vm253_vm3, %v3132_v10  ;;  %3552 = vmatprep.subr.mxu1 %v4035_v0  ;;  %v4045_v10 = vmov 4  }
 0x92b   :  { %3553 = vmatpush3.msra.mxu1 %v4243_v48  ;;  %3563 = vmatprep.subr.mxu0 %v4035_v0 }
 0x92c   :  { %3554 = vmatprep.subr.mxu1 %v4035_v0  ;;  %3564 = vmatpush3.msra.mxu0 %v4341_v43 }
 0x92d   :  { %3555 = vmatpush3.msra.mxu1 %v4248_v49  ;;  %3565 = vmatprep.subr.mxu0 %v4035_v0 }
 0x92e   :  { %3556 = vmatprep.subr.mxu1 %v4035_v0  ;;  %3566 = vmatpush3.msra.mxu0 %v4346_v44 }
 0x92f   :  { %3557 = vmatpush3.msra.mxu1 %v4255_v50  ;;  %3560 = vmatprep.mubr.msk.f32.mxu1 %vm4036_vm0, %v4035_v0 }
 0x930   :  { %3558 = vmatprep.subr.mxu1 %v4035_v0  ;;  %3567 = vmatprep.subr.mxu0 %v4035_v0 }
 0x931   :  { %3559 = vmatpush3.msra.mxu1 %v4262_v51  ;;  %3568 = vmatpush3.msra.mxu0 %v4356_v46 }
 0x932   :  { %3574 = vmatprep.subr.mxu1 %v4035_v0  ;;  %3569 = vmatprep.subr.mxu0 %v4035_v0 }
 0x933   :  { %3570 = vmatpush3.msra.mxu0 %v4363_v47  ;;  %3571 = vmatprep.mubr.msk.f32.mxu0 %vm4036_vm0, %v4035_v0 }
 0x934   :  { %3591 = vmatprep.subr.mxu0 %v4035_v0  ;;  %3822 = vset.pattern.permute.xlu0 %v4045_v10 }
 0x9dc   :  { %v1051_v11 = vpop.f32.mrf.mxu0 }
 0x9dd   :  { %v1052_v13 = vadd.f32 %v4319_v1, %v1051_v11 }
 0x9de   :  { %v3512_v12 = vpop.f32.mrf.mxu0 }
 0x9e0   :  { %v1126_v15 = vpop.f32.mrf.mxu1 }
 0x9e1   :  { %v1130_v17 = vadd.f32 %v1126_v15, %v1052_v13 }
 0x9e2   :  { %v3523_v19 = vpop.f32.mrf.mxu1 }
 0x9e3   :  { %v3131_v21 = vmul.f32 -1.442695, %v1130_v17 }
 0x9e5   :  { %3856 = vpow2.f32 %v3131_v21 }
 0x9e9   :  { %v1301_v23 = vpop.f32.mrf.mxu1 }
 0x9ea   :  { %v1231_v25 = vpop.f32.mrf.mxu0 }
 0x9eb   :  { %v1232_v27 = vadd.f32 %v4227_v32, %v1231_v25  ;;  %v3551_v28 = vpop.f32.mrf.mxu1 }
 0x9ec   :  { %v3540_v30 = vpop.f32.mrf.mxu0 }
 0x9ed   :  { %v1305_v31 = vadd.f32 %v1301_v23, %v1232_v27 }
 0x9ef   :  { %v3135_v34 = vmul.f32 -1.442695, %v1305_v31 }
 0x9f1   :  { %3858 = vpow2.f32 %v3135_v34 }
 0x9f2   :  { %v3857_v35 = vpop.eup %3856 }
 0x9f3   :  { %v1134_v36 = vadd.f32 1.0, %v3857_v35 }
 0x9f5   :  { %3860 = vrcp.f32 %v1134_v36 }
 0x9fe   :  { %v3859_v37 = vpop.eup %3858 }
 0x9ff   :  { %v1309_v38 = vadd.f32 1.0, %v3859_v37 }
 0xa01   :  { %3862 = vrcp.f32 %v1309_v38 }
 0xa02   :  { %v3861_v41 = vpop.eup %3860 }
 0xa03   :  { %v1137_v45 = vmul.f32 %v3861_v41, %v4232_v40 }
 0xa05   :  { %v1138_v52 = vsub.f32 %v1137_v45, %v4235_v42 }
 0xa07   :  { %1141 = vrot.lane.b32.xlu0 %v1138_v52, %s4039_s1  ;;  %v1139_v39 = vmul.f32 %v1138_v52, %v4437_v58 }
 0xa0e   :  { %v3863_v53 = vpop.eup %3862 }
 0xa0f   :  { %v1312_v54 = vmul.f32 %v3863_v53, %v4232_v40 }
 0xa11   :  { %v1313_v55 = vsub.f32 %v1312_v54, %v4235_v42 }
 0xa13   :  { %1316 = vrot.lane.b32.xlu1 %v1313_v55, %s4039_s1  ;;  %v1314_v6 = vmul.f32 %v1313_v55, %v4434_v33 }
 0xa79   :  { %v1142_v56 = vpop.permute.xlu0 %1141 }
 0xa7a   :  { %v1144_v62 = vmul.f32 %v1142_v56, %v1138_v52 }
 0xa7c   :  { %1146 = vrot.lane.b32.xlu0 %v1144_v62, %s4042_s15 }
 0xa85   :  { %v1317_v63 = vpop.permute.xlu1 %1316 }
 0xa86   :  { %v1319_v2 = vmul.f32 %v1317_v63, %v1313_v55 }
 0xa88   :  { %1321 = vrot.lane.b32.xlu1 %v1319_v2, %s4042_s15 }
 0xaee   :  { %v1147_v3 = vpop.permute.xlu0 %1146 }
 0xaef   :  { %v4508_v4 = vadd.f32 %v1147_v3, %v1139_v39 }
 0xaf1   :  { %3864 = vtanh.f32 %v4508_v4 }
 0xafa   :  { %v1322_v7 = vpop.permute.xlu1 %1321 }
 0xafb   :  { %v4512_v8 = vadd.f32 %v1322_v7, %v1314_v6 }
 0xafd   :  { %3866 = vtanh.f32 %v4512_v8 }
 0xafe   :  { %v3865_v9 = vpop.eup %3864 }
 0xaff   :  { %1152 = vrot.lane.b32.xlu0 %v3865_v9, %s4039_s1 }
 0xb03   :  { %1508 = vperm.xlu0 %3822, %v4127_v5  }
 0xb0a   :  { %v3867_v58 = vpop.eup %3866 }
 0xb0b   :  { %1327 = vrot.lane.b32.xlu1 %v3867_v58, %s4039_s1 }
 0xb71   :  { %v1153_v13 = vpop.permute.xlu0 %1152 }
 0xb72   :  { %v1155_v33 = vmul.f32 %v1153_v13, %v1138_v52 }
 0xb7d   :  { %v1328_v11 = vpop.permute.xlu1 %1327 }
 0xb7e   :  { %v1330_v12 = vmul.f32 %v1328_v11, %v1313_v55  ;;  %v1509_v17 = vpop.permute.xlu0 %1508 }
 0xb7f   :  { %vm1510_vm10 = vcmp.eq.s32.totalorder %v1509_v17, %v4200_v29  ;;  %v4591_v17 = vld [vmem:[#allocation2] sm:$0xff] }
 0xb80   :  { %1332 = vrot.lane.b32.xlu1 %v1330_v12, %s4042_s15  ;;  %v3139_v19 = vsel %vm1510_vm10, 1.0, %v4035_v0 }
 0xb84   :  { %1407 = vrot.lane.b32.xlu1 %v1155_v33, %s4042_s15 }
 0xbf2   :  { %v1333_v15 = vpop.permute.xlu1 %1332 }
 0xbf3   :  { %3561 = vmatmul.mubr.msk.f32.vlgmr.msra.gmra.mxu1 %vm101_vm1, %v1333_v15 }
 0xbf4   :  { %3575 = vmatpush3.msra.mxu1 %v4190_v26  ;;  %3588 = vmatprep.mubr.msk.f32.mxu1 %vm4036_vm0, %v4035_v0 }
 0xbf5   :  { %3576 = vmatprep.subr.mxu1 %v4035_v0 }
 0xbf6   :  { %3577 = vmatpush3.msra.mxu1 %v4188_v24  ;;  %v1408_v5 = vpop.permute.xlu1 %1407 }
 0xbf7   :  { %3578 = vmatprep.subr.mxu1 %v4035_v0  ;;  %3572 = vmatmul.mubr.msk.f32.vlgmr.msra.gmra.mxu0 %vm101_vm1, %v1408_v5  ;;  %v4046_v5 = vmov 5  }
 0xbf8   :  { %3579 = vmatpush3.msra.mxu1 %v4186_v22  ;;  %3592 = vmatpush3.msra.mxu0 %v4280_v57 }
 0xbf9   :  { %3580 = vmatprep.subr.mxu1 %v4035_v0  ;;  %3593 = vmatprep.subr.mxu0 %v4035_v0 }
 0xbfa   :  { %3581 = vmatpush3.msra.mxu1 %v4184_v20  ;;  %3594 = vmatpush3.msra.mxu0 %v4286_v59 }
 0xbfb   :  { %3582 = vmatprep.subr.mxu1 %v4035_v0  ;;  %3595 = vmatprep.subr.mxu0 %v4035_v0 }
 0xbfc   :  { %3583 = vmatpush3.msra.mxu1 %v4182_v18  ;;  %3596 = vmatpush3.msra.mxu0 %v4295_v60 }
 0xbfd   :  { %3584 = vmatprep.subr.mxu1 %v4035_v0  ;;  %3597 = vmatprep.subr.mxu0 %v4035_v0 }
 0xbfe   :  { %3585 = vmatpush3.msra.mxu1 %v4180_v16  ;;  %3598 = vmatpush3.msra.mxu0 %v4302_v61 }
 0xbff   :  { %3599 = vmatprep.mubr.msk.f32.mxu0 %vm4036_vm0, %v4035_v0  ;;  %3586 = vmatprep.subr.mxu1 %v4035_v0 }
 0xc00   :  { %3600 = vmatmul.mubr.msk.f32.vlgmr.msra.gmra.mxu0 %vm101_vm1, %v1333_v15  ;;  %3587 = vmatpush3.msra.mxu1 %v4178_v14 }
 0xc01   :  { %3589 = vmatmul.mubr.msk.f32.vlgmr.msra.gmra.mxu1 %vm253_vm3, %v3139_v19  ;;  %3602 = vmatprep.subr.mxu0 %v4035_v0 }
 0xc02   :  { %3603 = vmatpush3.msra.mxu0 %v4243_v48  ;;  %3613 = vmatprep.subr.mxu1 %v4035_v0 }
 0xc03   :  { %3604 = vmatprep.subr.mxu0 %v4035_v0  ;;  %3614 = vmatpush3.msra.mxu1 %v4341_v43 }
 0xc04   :  { %3605 = vmatpush3.msra.mxu0 %v4248_v49  ;;  %3615 = vmatprep.subr.mxu1 %v4035_v0 }
 0xc05   :  { %3606 = vmatprep.subr.mxu0 %v4035_v0  ;;  %3616 = vmatpush3.msra.mxu1 %v4346_v44 }
 0xc06   :  { %3607 = vmatpush3.msra.mxu0 %v4255_v50  ;;  %3610 = vmatprep.mubr.msk.f32.mxu0 %vm4036_vm0, %v4035_v0 }
 0xc07   :  { %3608 = vmatprep.subr.mxu0 %v4035_v0  ;;  %3617 = vmatprep.subr.mxu1 %v4035_v0 }
 0xc08   :  { %3609 = vmatpush3.msra.mxu0 %v4262_v51  ;;  %3618 = vmatpush3.msra.mxu1 %v4356_v46 }
 0xc09   :  { %3624 = vmatprep.subr.mxu0 %v4035_v0  ;;  %3619 = vmatprep.subr.mxu1 %v4035_v0 }
 0xc0a   :  { %3620 = vmatpush3.msra.mxu1 %v4363_v47  ;;  %3621 = vmatprep.mubr.msk.f32.mxu1 %vm4036_vm0, %v4035_v0 }
 0xc0b   :  { %3641 = vmatprep.subr.mxu1 %v4035_v0  ;;  %3823 = vset.pattern.permute.xlu0 %v4046_v5  ;;  %v4047_v5 = vmov 6  }
 0xcb3   :  { %v1402_v21 = vpop.f32.mrf.mxu1 }
 0xcb4   :  { %v1403_v25 = vadd.f32 %v4319_v1, %v1402_v21 }
 0xcb5   :  { %v3562_v23 = vpop.f32.mrf.mxu1 }
 0xcb7   :  { %v1477_v27 = vpop.f32.mrf.mxu0 }
 0xcb8   :  { %v1481_v28 = vadd.f32 %v1477_v27, %v1403_v25 }
 0xcb9   :  { %v3573_v30 = vpop.f32.mrf.mxu0 }
 0xcba   :  { %v3138_v31 = vmul.f32 -1.442695, %v1481_v28 }
 0xcbc   :  { %3868 = vpow2.f32 %v3138_v31 }
 0xcc0   :  { %v1652_v34 = vpop.f32.mrf.mxu0 }
 0xcc1   :  { %v1582_v35 = vpop.f32.mrf.mxu1 }
 0xcc2   :  { %v1583_v36 = vadd.f32 %v4227_v32, %v1582_v35  ;;  %v3601_v37 = vpop.f32.mrf.mxu0 }
 0xcc3   :  { %v3590_v38 = vpop.f32.mrf.mxu1 }
 0xcc4   :  { %v1656_v41 = vadd.f32 %v1652_v34, %v1583_v36  ;;  %v4650_v34 = vld [vmem:[#allocation4] ss:$0 sm:$0xff] }
 0xcc6   :  { %v3142_v45 = vmul.f32 -1.442695, %v1656_v41 }
 0xcc8   :  { %3870 = vpow2.f32 %v3142_v45 }
 0xcc9   :  { %v3869_v52 = vpop.eup %3868 }
 0xcca   :  { %v1485_v53 = vadd.f32 1.0, %v3869_v52 }
 0xccc   :  { %3872 = vrcp.f32 %v1485_v53 }
 0xcd5   :  { %v3871_v54 = vpop.eup %3870 }
 0xcd6   :  { %v1660_v55 = vadd.f32 1.0, %v3871_v54 }
 0xcd8   :  { %3874 = vrcp.f32 %v1660_v55 }
 0xcd9   :  { %v3873_v56 = vpop.eup %3872 }
 0xcda   :  { %v1488_v62 = vmul.f32 %v3873_v56, %v4232_v40 }
 0xcdc   :  { %v1489_v63 = vsub.f32 %v1488_v62, %v4235_v42 }
 0xcde   :  { %1492 = vrot.lane.b32.xlu0 %v1489_v63, %s4039_s1  ;;  %v1490_v10 = vmul.f32 %v1489_v63, %v4508_v4 }
 0xce5   :  { %v3875_v2 = vpop.eup %3874 }
 0xce6   :  { %v1663_v32 = vmul.f32 %v3875_v2, %v4232_v40 }
 0xce8   :  { %v1664_v39 = vsub.f32 %v1663_v32, %v4235_v42 }
 0xcea   :  { %1667 = vrot.lane.b32.xlu1 %v1664_v39, %s4039_s1  ;;  %v1665_v12 = vmul.f32 %v1664_v39, %v4512_v8 }
 0xd50   :  { %v1493_v3 = vpop.permute.xlu0 %1492 }
 0xd51   :  { %v1495_v6 = vmul.f32 %v1493_v3, %v1489_v63 }
 0xd53   :  { %1497 = vrot.lane.b32.xlu0 %v1495_v6, %s4042_s15 }
 0xd5c   :  { %v1668_v7 = vpop.permute.xlu1 %1667 }
 0xd5d   :  { %v1670_v9 = vmul.f32 %v1668_v7, %v1664_v39 }
 0xd5f   :  { %1672 = vrot.lane.b32.xlu1 %v1670_v9, %s4042_s15 }
 0xdc5   :  { %v1498_v58 = vpop.permute.xlu0 %1497 }
 0xdc6   :  { %v4583_v11 = vadd.f32 %v1498_v58, %v1490_v10 }
 0xdc8   :  { %3876 = vtanh.f32 %v4583_v11 }
 0xdd1   :  { %v1673_v13 = vpop.permute.xlu1 %1672 }
 0xdd2   :  { %v4587_v33 = vadd.f32 %v1673_v13, %v1665_v12 }
 0xdd4   :  { %3878 = vtanh.f32 %v4587_v33 }
 0xdd5   :  { %v3877_v15 = vpop.eup %3876 }
 0xdd6   :  { %1503 = vrot.lane.b32.xlu0 %v3877_v15, %s4039_s1 }
 0xdda   :  { %1859 = vperm.xlu0 %3823, %v4591_v17  }
 0xdde   :  { %3824 = vset.pattern.permute.xlu0 %v4047_v5 }
 0xde1   :  { %v3879_v4 = vpop.eup %3878 }
 0xde2   :  { %1678 = vrot.lane.b32.xlu1 %v3879_v4, %s4039_s1 }
 0xe48   :  { %v1504_v8 = vpop.permute.xlu0 %1503 }
 0xe49   :  { %v1506_v23 = vmul.f32 %v1504_v8, %v1489_v63 }
 0xe54   :  { %v1679_v19 = vpop.permute.xlu1 %1678 }
 0xe55   :  { %v1681_v21 = vmul.f32 %v1679_v19, %v1664_v39  ;;  %v1860_v28 = vpop.permute.xlu0 %1859 }
 0xe56   :  { %vm1861_vm11 = vcmp.eq.s32.totalorder %v1860_v28, %v4200_v29  ;;  %v4695_v28 = vld [vmem:[%s4909_s3 + $0x10] sm:$0xff] }
 0xe57   :  { %1683 = vrot.lane.b32.xlu1 %v1681_v21, %s4042_s15 }
 0xe5b   :  { %1758 = vrot.lane.b32.xlu1 %v1506_v23, %s4042_s15 }
 0xec9   :  { %v1684_v25 = vpop.permute.xlu1 %1683 }
 0xeca   :  { %3611 = vmatmul.mubr.msk.f32.vlgmr.msra.gmra.mxu0 %vm101_vm1, %v1684_v25 }
 0xecb   :  { %3625 = vmatpush3.msra.mxu0 %v4190_v26  ;;  %3638 = vmatprep.mubr.msk.f32.mxu0 %vm4036_vm0, %v4035_v0 }
 0xecc   :  { %3626 = vmatprep.subr.mxu0 %v4035_v0 }
 0xecd   :  { %3627 = vmatpush3.msra.mxu0 %v4188_v24  ;;  %v1759_v27 = vpop.permute.xlu1 %1758 }
 0xece   :  { %3628 = vmatprep.subr.mxu0 %v4035_v0  ;;  %3622 = vmatmul.mubr.msk.f32.vlgmr.msra.gmra.mxu1 %vm101_vm1, %v1759_v27 }
 0xecf   :  { %3629 = vmatpush3.msra.mxu0 %v4186_v22  ;;  %3642 = vmatpush3.msra.mxu1 %v4280_v57  ;;  %v3146_v57 = vsel %vm1861_vm11, 1.0, %v4035_v0 }
 0xed0   :  { %3630 = vmatprep.subr.mxu0 %v4035_v0  ;;  %3643 = vmatprep.subr.mxu1 %v4035_v0 }
 0xed1   :  { %3631 = vmatpush3.msra.mxu0 %v4184_v20  ;;  %3644 = vmatpush3.msra.mxu1 %v4286_v59 }
 0xed2   :  { %3632 = vmatprep.subr.mxu0 %v4035_v0  ;;  %3645 = vmatprep.subr.mxu1 %v4035_v0 }
 0xed3   :  { %3633 = vmatpush3.msra.mxu0 %v4182_v18  ;;  %3646 = vmatpush3.msra.mxu1 %v4295_v60 }
 0xed4   :  { %3634 = vmatprep.subr.mxu0 %v4035_v0  ;;  %3647 = vmatprep.subr.mxu1 %v4035_v0 }
 0xed5   :  { %3635 = vmatpush3.msra.mxu0 %v4180_v16  ;;  %3648 = vmatpush3.msra.mxu1 %v4302_v61 }
 0xed6   :  { %3649 = vmatprep.mubr.msk.f32.mxu1 %vm4036_vm0, %v4035_v0  ;;  %3636 = vmatprep.subr.mxu0 %v4035_v0 }
 0xed7   :  { %3650 = vmatmul.mubr.msk.f32.vlgmr.msra.gmra.mxu1 %vm101_vm1, %v1684_v25  ;;  %3637 = vmatpush3.msra.mxu0 %v4178_v14  ;;  %v4686_v25 = vld [vmem:[%s4909_s3 + $0x18] sm:$0xff] }
 0xed8   :  { %3639 = vmatmul.mubr.msk.f32.vlgmr.msra.gmra.mxu0 %vm253_vm3, %v3146_v57  ;;  %3652 = vmatprep.subr.mxu1 %v4035_v0  ;;  %v4705_v57 = vld [vmem:[%s4909_s3 + $0x8] sm:$0xff] }
 0xed9   :  { %3653 = vmatpush3.msra.mxu1 %v4243_v48  ;;  %3663 = vmatprep.subr.mxu0 %v4035_v0 }
 0xeda   :  { %3654 = vmatprep.subr.mxu1 %v4035_v0  ;;  %3664 = vmatpush3.msra.mxu0 %v4341_v43 }
 0xedb   :  { %3655 = vmatpush3.msra.mxu1 %v4248_v49  ;;  %3665 = vmatprep.subr.mxu0 %v4035_v0 }
 0xedc   :  { %3656 = vmatprep.subr.mxu1 %v4035_v0  ;;  %3666 = vmatpush3.msra.mxu0 %v4346_v44 }
 0xedd   :  { %3657 = vmatpush3.msra.mxu1 %v4255_v50  ;;  %3660 = vmatprep.mubr.msk.f32.mxu1 %vm4036_vm0, %v4035_v0 }
 0xede   :  { %3658 = vmatprep.subr.mxu1 %v4035_v0  ;;  %3667 = vmatprep.subr.mxu0 %v4035_v0 }
 0xedf   :  { %3659 = vmatpush3.msra.mxu1 %v4262_v51  ;;  %3668 = vmatpush3.msra.mxu0 %v4356_v46 }
 0xee0   :  { %3674 = vmatprep.subr.mxu1 %v4035_v0  ;;  %3669 = vmatprep.subr.mxu0 %v4035_v0 }
 0xee1   :  { %3670 = vmatpush3.msra.mxu0 %v4363_v47  ;;  %3671 = vmatprep.mubr.msk.f32.mxu0 %vm4036_vm0, %v4035_v0 }
 0xee2   :  { %3691 = vmatprep.subr.mxu0 %v4035_v0 }
 0xf8a   :  { %v1753_v48 = vpop.f32.mrf.mxu0 }
 0xf8b   :  { %v1754_v50 = vadd.f32 %v4319_v1, %v1753_v48 }
 0xf8c   :  { %v3612_v49 = vpop.f32.mrf.mxu0 }
 0xf8d   :  { %v4715_v49 = vld [vmem:[%s4909_s3] sm:$0xff] }
 0xf8e   :  { %v1828_v59 = vpop.f32.mrf.mxu1 }
 0xf8f   :  { %v1832_v60 = vadd.f32 %v1828_v59, %v1754_v50  ;;  %v4728_v50 = vld [vmem:[%s4908_s2 + $0x38] sm:$0xff]  ;;  %v4737_v59 = vld [vmem:[%s4908_s2 + $0x30] sm:$0xff] }
 0xf90   :  { %v3623_v51 = vpop.f32.mrf.mxu1 }
 0xf91   :  { %v3145_v61 = vmul.f32 -1.442695, %v1832_v60  ;;  %v4746_v60 = vld [vmem:[%s4908_s2 + $0x28] sm:$0xff] }
 0xf93   :  { %3880 = vpow2.f32 %v3145_v61  ;;  %v4766_v61 = vld [vmem:[#allocation4 + $0x1] ss:$0 sm:$0xff] }
 0xf97   :  { %v2003_v30 = vpop.f32.mrf.mxu1 }
 0xf98   :  { %v1933_v31 = vpop.f32.mrf.mxu0 }
 0xf99   :  { %v1934_v35 = vadd.f32 %v4650_v34, %v1933_v31  ;;  %v3651_v36 = vpop.f32.mrf.mxu1 }
 0xf9a   :  { %v3640_v37 = vpop.f32.mrf.mxu0 }
 0xf9b   :  { %v2007_v38 = vadd.f32 %v2003_v30, %v1934_v35 }
 0xf9d   :  { %v3149_v41 = vmul.f32 -1.442695, %v2007_v38 }
 0xf9f   :  { %3882 = vpow2.f32 %v3149_v41 }
 0xfa0   :  { %v3881_v45 = vpop.eup %3880 }
 0xfa1   :  { %v1836_v52 = vadd.f32 1.0, %v3881_v45 }
 0xfa3   :  { %3884 = vrcp.f32 %v1836_v52 }
 0xfac   :  { %v3883_v1 = vpop.eup %3882 }
 0xfad   :  { %v2011_v53 = vadd.f32 1.0, %v3883_v1 }
 0xfaf   :  { %3886 = vrcp.f32 %v2011_v53 }
 0xfb0   :  { %v3885_v54 = vpop.eup %3884 }
 0xfb1   :  { %v1839_v55 = vmul.f32 %v3885_v54, %v4232_v40 }
 0xfb3   :  { %v1840_v56 = vsub.f32 %v1839_v55, %v4235_v42 }
 0xfb5   :  { %1843 = vrot.lane.b32.xlu0 %v1840_v56, %s4039_s1  ;;  %v1841_v7 = vmul.f32 %v1840_v56, %v4583_v11 }
 0xfbc   :  { %v3887_v62 = vpop.eup %3886 }
 0xfbd   :  { %v2014_v63 = vmul.f32 %v3887_v62, %v4232_v40 }
 0xfbf   :  { %v2015_v2 = vsub.f32 %v2014_v63, %v4235_v42 }
 0xfc1   :  { %2018 = vrot.lane.b32.xlu1 %v2015_v2, %s4039_s1  ;;  %v2016_v58 = vmul.f32 %v2015_v2, %v4587_v33 }
0x1027   :  { %v1844_v32 = vpop.permute.xlu0 %1843 }
0x1028   :  { %v1846_v39 = vmul.f32 %v1844_v32, %v1840_v56 }
0x102a   :  { %1848 = vrot.lane.b32.xlu0 %v1846_v39, %s4042_s15 }
0x1033   :  { %v2019_v3 = vpop.permute.xlu1 %2018 }
0x1034   :  { %v2021_v6 = vmul.f32 %v2019_v3, %v2015_v2 }
0x1036   :  { %2023 = vrot.lane.b32.xlu1 %v2021_v6, %s4042_s15 }
0x109c   :  { %v1849_v9 = vpop.permute.xlu0 %1848 }
0x109d   :  { %v4662_v10 = vadd.f32 %v1849_v9, %v1841_v7 }
0x109f   :  { %3888 = vtanh.f32 %v4662_v10 }
0x10a8   :  { %v2024_v12 = vpop.permute.xlu1 %2023 }
0x10a9   :  { %v4666_v13 = vadd.f32 %v2024_v12, %v2016_v58 }
0x10ab   :  { %3890 = vtanh.f32 %v4666_v13 }
0x10ac   :  { %v3889_v15 = vpop.eup %3888 }
0x10ad   :  { %1854 = vrot.lane.b32.xlu0 %v3889_v15, %s4039_s1 }
0x10b1   :  { %2210 = vperm.xlu0 %3824, %v4591_v17  }
0x10b8   :  { %v3891_v11 = vpop.eup %3890 }
0x10b9   :  { %2029 = vrot.lane.b32.xlu1 %v3891_v11, %s4039_s1 }
0x111f   :  { %v1855_v21 = vpop.permute.xlu0 %1854 }
0x1120   :  { %v1857_v33 = vmul.f32 %v1855_v21, %v1840_v56 }
0x112b   :  { %v2030_v4 = vpop.permute.xlu1 %2029 }
0x112c   :  { %v2032_v19 = vmul.f32 %v2030_v4, %v2015_v2  ;;  %v2211_v27 = vpop.permute.xlu0 %2210 }
0x112d   :  { %vm2212_vm12 = vcmp.eq.s32.totalorder %v2211_v27, %v4200_v29 }
0x112e   :  { %2034 = vrot.lane.b32.xlu1 %v2032_v19, %s4042_s15  ;;  %v3153_v48 = vsel %vm2212_vm12, 1.0, %v4035_v0 }
0x1132   :  { %2109 = vrot.lane.b32.xlu1 %v1857_v33, %s4042_s15  ;;  %v4048_v33 = vmov 7  }
0x1133   :  { %3825 = vset.pattern.permute.xlu0 %v4048_v33 }
0x11a0   :  { %v2035_v8 = vpop.permute.xlu1 %2034 }
0x11a1   :  { %3661 = vmatmul.mubr.msk.f32.vlgmr.msra.gmra.mxu1 %vm101_vm1, %v2035_v8 }
0x11a2   :  { %3675 = vmatpush3.msra.mxu1 %v4190_v26  ;;  %3688 = vmatprep.mubr.msk.f32.mxu1 %vm4036_vm0, %v4035_v0 }
0x11a3   :  { %3676 = vmatprep.subr.mxu1 %v4035_v0 }
0x11a4   :  { %3677 = vmatpush3.msra.mxu1 %v4188_v24  ;;  %v2110_v23 = vpop.permute.xlu1 %2109 }
0x11a5   :  { %3678 = vmatprep.subr.mxu1 %v4035_v0  ;;  %3672 = vmatmul.mubr.msk.f32.vlgmr.msra.gmra.mxu0 %vm101_vm1, %v2110_v23 }
0x11a6   :  { %3679 = vmatpush3.msra.mxu1 %v4186_v22  ;;  %3692 = vmatpush3.msra.mxu0 %v4686_v25 }
0x11a7   :  { %3680 = vmatprep.subr.mxu1 %v4035_v0  ;;  %3693 = vmatprep.subr.mxu0 %v4035_v0 }
0x11a8   :  { %3681 = vmatpush3.msra.mxu1 %v4184_v20  ;;  %3694 = vmatpush3.msra.mxu0 %v4695_v28 }
0x11a9   :  { %3682 = vmatprep.subr.mxu1 %v4035_v0  ;;  %3695 = vmatprep.subr.mxu0 %v4035_v0 }
0x11aa   :  { %3683 = vmatpush3.msra.mxu1 %v4182_v18  ;;  %3696 = vmatpush3.msra.mxu0 %v4705_v57 }
0x11ab   :  { %3684 = vmatprep.subr.mxu1 %v4035_v0  ;;  %3697 = vmatprep.subr.mxu0 %v4035_v0 }
0x11ac   :  { %3685 = vmatpush3.msra.mxu1 %v4180_v16  ;;  %3698 = vmatpush3.msra.mxu0 %v4715_v49 }
0x11ad   :  { %3699 = vmatprep.mubr.msk.f32.mxu0 %vm4036_vm0, %v4035_v0  ;;  %3686 = vmatprep.subr.mxu1 %v4035_v0 }
0x11ae   :  { %3700 = vmatmul.mubr.msk.f32.vlgmr.msra.gmra.mxu0 %vm101_vm1, %v2035_v8  ;;  %3687 = vmatpush3.msra.mxu1 %v4178_v14 }
0x11af   :  { %3689 = vmatmul.mubr.msk.f32.vlgmr.msra.gmra.mxu1 %vm253_vm3, %v3153_v48  ;;  %3702 = vmatprep.subr.mxu0 %v4035_v0 }
0x11b0   :  { %3703 = vmatpush3.msra.mxu0 %v4728_v50  ;;  %3713 = vmatprep.subr.mxu1 %v4035_v0 }
0x11b1   :  { %3704 = vmatprep.subr.mxu0 %v4035_v0  ;;  %3714 = vmatpush3.msra.mxu1 %v4341_v43  ;;  %v4756_v43 = vld [vmem:[%s4908_s2 + $0x20] sm:$0xff] }
0x11b2   :  { %3705 = vmatpush3.msra.mxu0 %v4737_v59  ;;  %3715 = vmatprep.subr.mxu1 %v4035_v0 }
0x11b3   :  { %3706 = vmatprep.subr.mxu0 %v4035_v0  ;;  %3716 = vmatpush3.msra.mxu1 %v4346_v44 }
0x11b4   :  { %3707 = vmatpush3.msra.mxu0 %v4746_v60  ;;  %3710 = vmatprep.mubr.msk.f32.mxu0 %vm4036_vm0, %v4035_v0 }
0x11b5   :  { %3708 = vmatprep.subr.mxu0 %v4035_v0  ;;  %3717 = vmatprep.subr.mxu1 %v4035_v0 }
0x11b6   :  { %3709 = vmatpush3.msra.mxu0 %v4756_v43  ;;  %3718 = vmatpush3.msra.mxu1 %v4356_v46 }
0x11b7   :  { %3724 = vmatprep.subr.mxu0 %v4035_v0  ;;  %3719 = vmatprep.subr.mxu1 %v4035_v0 }
0x11b8   :  { %3720 = vmatpush3.msra.mxu1 %v4363_v47  ;;  %3721 = vmatprep.mubr.msk.f32.mxu1 %vm4036_vm0, %v4035_v0 }
0x11b9   :  { %3741 = vmatprep.subr.mxu1 %v4035_v0 }
0x1261   :  { %v2104_v44 = vpop.f32.mrf.mxu1 }
0x1262   :  { %v2105_v30 = vadd.f32 %v4766_v61, %v2104_v44 }
0x1263   :  { %v3662_v51 = vpop.f32.mrf.mxu1 }
0x1265   :  { %v2179_v31 = vpop.f32.mrf.mxu0 }
0x1266   :  { %v2183_v35 = vadd.f32 %v2179_v31, %v2105_v30 }
0x1267   :  { %v3673_v46 = vpop.f32.mrf.mxu0 }
0x1268   :  { %v3152_v36 = vmul.f32 -1.442695, %v2183_v35 }
0x126a   :  { %3892 = vpow2.f32 %v3152_v36 }
0x126e   :  { %v2354_v37 = vpop.f32.mrf.mxu0 }
0x126f   :  { %v2284_v38 = vpop.f32.mrf.mxu1 }
0x1270   :  { %v2285_v47 = vadd.f32 %v4650_v34, %v2284_v38  ;;  %v3701_v41 = vpop.f32.mrf.mxu0 }
0x1271   :  { %v3690_v45 = vpop.f32.mrf.mxu1 }
0x1272   :  { %v2358_v52 = vadd.f32 %v2354_v37, %v2285_v47 }
0x1274   :  { %v3156_v1 = vmul.f32 -1.442695, %v2358_v52 }
0x1276   :  { %3894 = vpow2.f32 %v3156_v1 }
0x1277   :  { %v3893_v53 = vpop.eup %3892 }
0x1278   :  { %v2187_v54 = vadd.f32 1.0, %v3893_v53 }
0x127a   :  { %3896 = vrcp.f32 %v2187_v54 }
0x1283   :  { %v3895_v55 = vpop.eup %3894 }
0x1284   :  { %v2362_v56 = vadd.f32 1.0, %v3895_v55 }
0x1286   :  { %3898 = vrcp.f32 %v2362_v56 }
0x1287   :  { %v3897_v62 = vpop.eup %3896 }
0x1288   :  { %v2190_v63 = vmul.f32 %v3897_v62, %v4232_v40 }
0x128a   :  { %v2191_v2 = vsub.f32 %v2190_v63, %v4235_v42 }
0x128c   :  { %2194 = vrot.lane.b32.xlu0 %v2191_v2, %s4039_s1  ;;  %v2192_v12 = vmul.f32 %v2191_v2, %v4662_v10 }
0x1293   :  { %v3899_v32 = vpop.eup %3898 }
0x1294   :  { %v2365_v39 = vmul.f32 %v3899_v32, %v4232_v40 }
0x1296   :  { %v2366_v3 = vsub.f32 %v2365_v39, %v4235_v42 }
0x1298   :  { %2369 = vrot.lane.b32.xlu1 %v2366_v3, %s4039_s1  ;;  %v2367_v11 = vmul.f32 %v2366_v3, %v4666_v13 }
0x12fe   :  { %v2195_v6 = vpop.permute.xlu0 %2194 }
0x12ff   :  { %v2197_v7 = vmul.f32 %v2195_v6, %v2191_v2 }
0x1301   :  { %2199 = vrot.lane.b32.xlu0 %v2197_v7, %s4042_s15 }
0x130a   :  { %v2370_v9 = vpop.permute.xlu1 %2369 }
0x130b   :  { %v2372_v58 = vmul.f32 %v2370_v9, %v2366_v3 }
0x130d   :  { %2374 = vrot.lane.b32.xlu1 %v2372_v58, %s4042_s15 }
0x1373   :  { %v2200_v15 = vpop.permute.xlu0 %2199 }
0x1374   :  { %v4779_v5 = vadd.f32 %v2200_v15, %v2192_v12 }
0x1376   :  { %3900 = vtanh.f32 %v4779_v5 }
0x137f   :  { %v2375_v4 = vpop.permute.xlu1 %2374 }
0x1380   :  { %v4783_v19 = vadd.f32 %v2375_v4, %v2367_v11 }
0x1382   :  { %3902 = vtanh.f32 %v4783_v19 }
0x1383   :  { %v3901_v21 = vpop.eup %3900 }
0x1384   :  { %2205 = vrot.lane.b32.xlu0 %v3901_v21, %s4039_s1 }
0x1388   :  { %2561 = vperm.xlu0 %3825, %v4591_v17  }
0x138f   :  { %v3903_v10 = vpop.eup %3902 }
0x1390   :  { %2380 = vrot.lane.b32.xlu1 %v3903_v10, %s4039_s1 }
0x13f6   :  { %v2206_v27 = vpop.permute.xlu0 %2205 }
0x13f7   :  { %v2208_v13 = vmul.f32 %v2206_v27, %v2191_v2 }
0x1402   :  { %v2381_v8 = vpop.permute.xlu1 %2380 }
0x1403   :  { %v2383_v23 = vmul.f32 %v2381_v8, %v2366_v3  ;;  %v2562_v44 = vpop.permute.xlu0 %2561 }
0x1404   :  { %vm2563_vm13 = vcmp.eq.s32.totalorder %v2562_v44, %v4200_v29 }
0x1405   :  { %2385 = vrot.lane.b32.xlu1 %v2383_v23, %s4042_s15 }
0x1409   :  { %2460 = vrot.lane.b32.xlu1 %v2208_v13, %s4042_s15 }
0x1477   :  { %v2386_v48 = vpop.permute.xlu1 %2385 }
0x1478   :  { %3711 = vmatmul.mubr.msk.f32.vlgmr.msra.gmra.mxu0 %vm101_vm1, %v2386_v48 }
0x1479   :  { %3725 = vmatpush3.msra.mxu0 %v4190_v26  ;;  %3738 = vmatprep.mubr.msk.f32.mxu0 %vm4036_vm0, %v4035_v0 }
0x147a   :  { %3726 = vmatprep.subr.mxu0 %v4035_v0 }
0x147b   :  { %3727 = vmatpush3.msra.mxu0 %v4188_v24  ;;  %v2461_v17 = vpop.permute.xlu1 %2460 }
0x147c   :  { %3728 = vmatprep.subr.mxu0 %v4035_v0  ;;  %3722 = vmatmul.mubr.msk.f32.vlgmr.msra.gmra.mxu1 %vm101_vm1, %v2461_v17 }
0x147d   :  { %3729 = vmatpush3.msra.mxu0 %v4186_v22  ;;  %3742 = vmatpush3.msra.mxu1 %v4686_v25  ;;  %v3160_v22 = vsel %vm2563_vm13, 1.0, %v4035_v0 }
0x147e   :  { %3730 = vmatprep.subr.mxu0 %v4035_v0  ;;  %3743 = vmatprep.subr.mxu1 %v4035_v0 }
0x147f   :  { %3731 = vmatpush3.msra.mxu0 %v4184_v20  ;;  %3744 = vmatpush3.msra.mxu1 %v4695_v28  ;;  %v3940_v20 = vld [vmem:[%s4909_s3 + $0x20] sm:$0xff] }
0x1480   :  { %3732 = vmatprep.subr.mxu0 %v4035_v0  ;;  %3745 = vmatprep.subr.mxu1 %v4035_v0 }
0x1481   :  { %3733 = vmatpush3.msra.mxu0 %v4182_v18  ;;  %3746 = vmatpush3.msra.mxu1 %v4705_v57  ;;  %v3937_v18 = vld [vmem:[%s4909_s3 + $0x38] sm:$0xff] }
0x1482   :  { %3734 = vmatprep.subr.mxu0 %v4035_v0  ;;  %3747 = vmatprep.subr.mxu1 %v4035_v0 }
0x1483   :  { %3735 = vmatpush3.msra.mxu0 %v4180_v16  ;;  %3748 = vmatpush3.msra.mxu1 %v4715_v49  ;;  %v3939_v16 = vld [vmem:[%s4909_s3 + $0x28] sm:$0xff] }
0x1484   :  { %3749 = vmatprep.mubr.msk.f32.mxu1 %vm4036_vm0, %v4035_v0  ;;  %3736 = vmatprep.subr.mxu0 %v4035_v0 }
0x1485   :  { %3750 = vmatmul.mubr.msk.f32.vlgmr.msra.gmra.mxu1 %vm101_vm1, %v2386_v48  ;;  %3737 = vmatpush3.msra.mxu0 %v4178_v14  ;;  %v3938_v14 = vld [vmem:[%s4909_s3 + $0x30] sm:$0xff] }
0x1486   :  { %3739 = vmatmul.mubr.msk.f32.vlgmr.msra.gmra.mxu0 %vm253_vm3, %v3160_v22  ;;  %3763 = vmatprep.subr.mxu0 %v4035_v0 }
0x1487   :  { %3764 = vmatpush3.msra.mxu0 %v3937_v18  ;;  %3771 = vmatprep.mubr.msk.f32.mxu0 %vm4036_vm0, %v4035_v0 }
0x1488   :  { %3765 = vmatprep.subr.mxu0 %v4035_v0  ;;  %3752 = vmatprep.subr.mxu1 %v4035_v0 }
0x1489   :  { %3766 = vmatpush3.msra.mxu0 %v3938_v14  ;;  %3753 = vmatpush3.msra.mxu1 %v4728_v50 }
0x148a   :  { %3767 = vmatprep.subr.mxu0 %v4035_v0  ;;  %3754 = vmatprep.subr.mxu1 %v4035_v0 }
0x148b   :  { %3768 = vmatpush3.msra.mxu0 %v3939_v16  ;;  %3755 = vmatpush3.msra.mxu1 %v4737_v59  ;;  %v2914_v16 = vld [vmem:[#allocation6 + $0x18] sm:$0xff] }
0x148c   :  { %3769 = vmatprep.subr.mxu0 %v4035_v0  ;;  %3756 = vmatprep.subr.mxu1 %v4035_v0 }
0x148d   :  { %3770 = vmatpush3.msra.mxu0 %v3940_v20  ;;  %3757 = vmatpush3.msra.mxu1 %v4746_v60  ;;  %v2913_v20 = vld [vmem:[#allocation6 + $0x10] sm:$0xff] }
0x148e   :  { %3758 = vmatprep.subr.mxu1 %v4035_v0  ;;  %3760 = vmatprep.mubr.msk.f32.mxu1 %vm4036_vm0, %v4035_v0 }
0x148f   :  { %3759 = vmatpush3.msra.mxu1 %v4756_v43  ;;  %3785 = vmatprep.subr.mxu0 %v4035_v0 }
0x1490   :  { %3774 = vmatprep.subr.mxu1 %v4035_v0 }
0x1538   :  { %v2455_v24 = vpop.f32.mrf.mxu0 }
0x1539   :  { %v2456_v29 = vadd.f32 %v4766_v61, %v2455_v24  ;;  %v2912_v24 = vld [vmem:[#allocation6 + $0x8] sm:$0xff] }
0x153a   :  { %v3712_v26 = vpop.f32.mrf.mxu0 }
0x153b   :  { %v3000_v26 = vld [vmem:[%s4913_s7 + $0x18] sm:$0xff] }
0x153c   :  { %v2530_v25 = vpop.f32.mrf.mxu1 }
0x153d   :  { %v2534_v28 = vadd.f32 %v2530_v25, %v2456_v29  ;;  %v2999_v29 = vld [vmem:[%s4913_s7 + $0x10] sm:$0xff] }
0x153e   :  { %v3723_v57 = vpop.f32.mrf.mxu1 }
0x153f   :  { %v3159_v49 = vmul.f32 -1.442695, %v2534_v28 }
0x1541   :  { %3904 = vpow2.f32 %v3159_v49  ;;  %v2998_v49 = vld [vmem:[%s4913_s7 + $0x8] sm:$0xff] }
0x1545   :  { %v2705_v50 = vpop.f32.mrf.mxu1 }
0x1546   :  { %v2635_v59 = vpop.f32.mrf.mxu0 }
0x1547   :  { %v2636_v60 = vadd.f32 %v4650_v34, %v2635_v59  ;;  %v3751_v51 = vpop.f32.mrf.mxu1  ;;  %v3167_v59 = vld [vmem:[%s4912_s6] ss:$0 sm:$0xff] }
0x1548   :  { %v3740_v30 = vpop.f32.mrf.mxu0 }
0x1549   :  { %v2709_v43 = vadd.f32 %v2705_v50, %v2636_v60  ;;  %v2997_v50 = vld [vmem:[%s4913_s7] sm:$0xff] }
0x154b   :  { %v3163_v31 = vmul.f32 -1.442695, %v2709_v43  ;;  %v3169_v43 = vld [vmem:[#allocation7] ss:$0 sm:$0xff] }
0x154d   :  { %3906 = vpow2.f32 %v3163_v31 }
0x154e   :  { %v3905_v35 = vpop.eup %3904 }
0x154f   :  { %v2538_v46 = vadd.f32 1.0, %v3905_v35 }
0x1551   :  { %3908 = vrcp.f32 %v2538_v46 }
0x155a   :  { %v3907_v36 = vpop.eup %3906 }
0x155b   :  { %v2713_v37 = vadd.f32 1.0, %v3907_v36 }
0x155d   :  { %3910 = vrcp.f32 %v2713_v37 }
0x155e   :  { %v3909_v38 = vpop.eup %3908 }
0x155f   :  { %v2541_v47 = vmul.f32 %v3909_v38, %v4232_v40 }
0x1561   :  { %v2542_v41 = vsub.f32 %v2541_v47, %v4235_v42 }
0x1563   :  { %2545 = vrot.lane.b32.xlu0 %v2542_v41, %s4039_s1  ;;  %v2543_v56 = vmul.f32 %v2542_v41, %v4779_v5 }
0x156a   :  { %v3911_v45 = vpop.eup %3910 }
0x156b   :  { %v2716_v34 = vmul.f32 %v3911_v45, %v4232_v40 }
0x156d   :  { %v2717_v52 = vsub.f32 %v2716_v34, %v4235_v42 }
0x156f   :  { %2720 = vrot.lane.b32.xlu1 %v2717_v52, %s4039_s1  ;;  %v2718_v2 = vmul.f32 %v2717_v52, %v4783_v19 }
0x15d5   :  { %v2546_v1 = vpop.permute.xlu0 %2545 }
0x15d6   :  { %v2548_v53 = vmul.f32 %v2546_v1, %v2542_v41 }
0x15d8   :  { %2550 = vrot.lane.b32.xlu0 %v2548_v53, %s4042_s15 }
0x15e1   :  { %v2721_v54 = vpop.permute.xlu1 %2720 }
0x15e2   :  { %v2723_v55 = vmul.f32 %v2721_v54, %v2717_v52 }
0x15e4   :  { %2725 = vrot.lane.b32.xlu1 %v2723_v55, %s4042_s15 }
0x164a   :  { %v2551_v62 = vpop.permute.xlu0 %2550 }
0x164b   :  { %v2553_v63 = vadd.f32 %v2551_v62, %v2543_v56 }
0x164d   :  { %3912 = vtanh.f32 %v2553_v63 }
0x1656   :  { %v2726_v32 = vpop.permute.xlu1 %2725 }
0x1657   :  { %v2728_v39 = vadd.f32 %v2726_v32, %v2718_v2 }
0x1659   :  { %3914 = vtanh.f32 %v2728_v39 }
0x165a   :  { %v3913_v3 = vpop.eup %3912 }
0x165b   :  { %2556 = vrot.lane.b32.xlu0 %v3913_v3, %s4039_s1 }
0x1666   :  { %v3915_v6 = vpop.eup %3914 }
0x1667   :  { %2731 = vrot.lane.b32.xlu1 %v3915_v6, %s4039_s1 }
0x16cd   :  { %v2557_v7 = vpop.permute.xlu0 %2556 }
0x16ce   :  { %v2559_v9 = vmul.f32 %v2557_v7, %v2542_v41 }
0x16d0   :  { %2811 = vrot.lane.b32.xlu0 %v2559_v9, %s4042_s15 }
0x16d9   :  { %v2732_v58 = vpop.permute.xlu1 %2731 }
0x16da   :  { %v2734_v12 = vmul.f32 %v2732_v58, %v2717_v52 }
0x16dc   :  { %2736 = vrot.lane.b32.xlu1 %v2734_v12, %s4042_s15 }
0x1742   :  { %v2812_v15 = vpop.permute.xlu0 %2811 }
0x1743   :  { %3772 = vmatmul.mubr.msk.f32.vlgmr.msra.gmra.mxu0 %vm101_vm1, %v2812_v15 }
0x1744   :  { %3793 = vmatprep.mubr.msk.f32.mxu0 %vm4036_vm0, %v4035_v0  ;;  %3786 = vmatpush3.msra.mxu0 %v3000_v26 }
0x1745   :  { %3787 = vmatprep.subr.mxu0 %v4035_v0 }
0x1746   :  { %3788 = vmatpush3.msra.mxu0 %v2999_v29 }
0x1747   :  { %3789 = vmatprep.subr.mxu0 %v4035_v0 }
0x1748   :  { %3790 = vmatpush3.msra.mxu0 %v2998_v49 }
0x1749   :  { %3791 = vmatprep.subr.mxu0 %v4035_v0 }
0x174a   :  { %3792 = vmatpush3.msra.mxu0 %v2997_v50 }
0x174e   :  { %v2737_v5 = vpop.permute.xlu1 %2736 }
0x174f   :  { %3761 = vmatmul.mubr.msk.f32.vlgmr.msra.gmra.mxu1 %vm101_vm1, %v2737_v5 }
0x1750   :  { %3782 = vmatprep.mubr.msk.f32.mxu1 %vm4036_vm0, %v4035_v0  ;;  %3775 = vmatpush3.msra.mxu1 %v2914_v16 }
0x1751   :  { %3776 = vmatprep.subr.mxu1 %v4035_v0 }
0x1752   :  { %3777 = vmatpush3.msra.mxu1 %v2913_v20 }
0x1753   :  { %3778 = vmatprep.subr.mxu1 %v4035_v0 }
0x1754   :  { %3779 = vmatpush3.msra.mxu1 %v2912_v24 }
0x1755   :  { %3780 = vmatprep.subr.mxu1 %v4035_v0 }
0x1803   :  { %v2881_v11 = vpop.f32.mrf.mxu0 }
0x1805   :  { %v3773_v4 = vpop.f32.mrf.mxu0 }
0x180f   :  { %v2806_v19 = vpop.f32.mrf.mxu1 }
0x1810   :  { %v2807_v21 = vadd.f32 %v4766_v61, %v2806_v19 }
0x1811   :  { %v3762_v33 = vpop.f32.mrf.mxu1 }
0x1812   :  { %v2885_v10 = vadd.f32 %v2881_v11, %v2807_v21 }
0x1814   :  { %v3166_v8 = vmul.f32 -1.442695, %v2885_v10 }
0x1816   :  { %3916 = vpow2.f32 %v3166_v8 }
0x1823   :  { %v3917_v23 = vpop.eup %3916 }
0x1824   :  { %v2889_v27 = vadd.f32 1.0, %v3917_v23 }
0x1826   :  { %3918 = vrcp.f32 %v2889_v27 }
0x1833   :  { %v3919_v13 = vpop.eup %3918 }
0x1834   :  { %v2892_v48 = vmul.f32 %v3919_v13, %v4232_v40  ;;  %v2911_v40 = vld [vmem:[#allocation6] sm:$0xff] }
0x1835   :  { %3781 = vmatpush3.msra.mxu1 %v2911_v40 }
0x1836   :  { %v2893_v17 = vsub.f32 %v2892_v48, %v4235_v42 }
0x1838   :  { %2896 = vrot.lane.b32.xlu1 %v2893_v17, %s4039_s1  ;;  %v2894_v18 = vmul.f32 %v2893_v17, %v2553_v63 }
0x18aa   :  { %v2897_v44 = vpop.permute.xlu1 %2896 }
0x18ab   :  { %v2899_v22 = vmul.f32 %v2897_v44, %v2893_v17 }
0x18ad   :  { %2901 = vrot.lane.b32.xlu0 %v2899_v22, %s4042_s15 }
0x191f   :  { %v2902_v61 = vpop.permute.xlu0 %2901 }
0x1920   :  { %v2904_v14 = vadd.f32 %v2902_v61, %v2894_v18 }
0x1922   :  { %3920 = vtanh.f32 %v2904_v14 }
0x192f   :  { %v3921_v42 = vpop.eup %3920 }
0x1930   :  { %2907 = vrot.lane.b32.xlu1 %v3921_v42, %s4039_s1 }
0x19a2   :  { %v2908_v25 = vpop.permute.xlu1 %2907 }
0x19a3   :  { %v2910_v28 = vmul.f32 %v2908_v25, %v2893_v17 }
0x19a5   :  { %2923 = vrot.lane.b32.xlu0 %v2910_v28, %s4042_s15 }
0x1a17   :  { %v2924_v57 = vpop.permute.xlu0 %2923 }
0x1a18   :  { %3783 = vmatmul.mubr.msk.f32.vlgmr.msra.gmra.mxu1 %vm101_vm1, %v2924_v57 }
0x1ad8   :  { %v2993_v60 = vpop.f32.mrf.mxu1 }
0x1ad9   :  { %v2994_v51 = vadd.f32 %v3167_v59, %v2993_v60 }
0x1ada   :  { %v3784_v30 = vpop.f32.mrf.mxu1 }
0x1adb   :  { %3794 = vmatmul.mubr.msk.f32.vlgmr.msra.gmra.mxu0 %vm101_vm1, %v2994_v51 }
0x1b9b   :  { %v3077_v31 = vpop.f32.mrf.mxu0 }
0x1b9c   :  { %v3078_v35 = vadd.f32 %v3169_v43, %v3077_v31 }
0x1b9d   :  { %v3795_v46 = vpop.f32.mrf.mxu0 }
0x1b9e   :  { %v3171_v36 = vmul.f32 -1.442695, %v3078_v35 }
0x1ba0   :  { %3922 = vpow2.f32 %v3171_v36 }
0x1bad   :  { %v3923_v0 = vpop.eup %3922 }
0x1bae   :  { %v3084_v37 = vadd.f32 1.0, %v3923_v0 }
0x1bb0   :  { %3924 = vrcp.f32 %v3084_v37 }
0x1bbd   :  { %v3925_v38 = vpop.eup %3924 }
0x1bbe   :  { %3088 = vst.msk [vmem:[%s4915_s9] sm:$0xff] %vm3087_vm14, %v3925_v38 }
0x1bbf   :  { %3093 = vsyncpa [#allocation3], 1 }
0x1bc0   :  { %3094 = vsyncpa [#allocation5], 1 }
0x1bc1   :  { %3095 = vsyncpa [#allocation8], 1 }

</bundles_post_ra>
